<compile_context>
chip_gen: v5e
topology: v5e:2x2
jax: 0.10.0
libtpu: 0.0.40
codegen_flags: <defaults>
</compile_context>

<pallas_src>
import functools

import jax
import jax.numpy as jnp
import numpy as np
from jax import lax
from jax.experimental import pallas as pl
from jax.experimental.pallas import tpu as pltpu


# ----------------------------------------------------------------------------
# Fused LSTM-encoder + MLP-decoder kernel (single invocation, no grid).
# ----------------------------------------------------------------------------
def _make_fused_kernel(B, T, H, e_layers, pred_len, dec_relu):
    """Build the fused kernel body.

    Kernel ref order:
      x [B, T, enc_in],
      layer 0:       w_ih_t [I,4H], w_hh_t [H,4H], b [1,4H]
      layers l>0:    w_cat  [2H,4H],               b [1,4H]
      decoder:       (w_t [in,out], b [1,out]) * n_decoder_linears,
      out [B, pred_len, c_out]
    """
    n_lstm = 3 + 2 * (e_layers - 1)
    n_dec = 2 * len(dec_relu)

    def kernel(*refs):
        x_ref = refs[0]
        lstm_refs = refs[1:1 + n_lstm]
        dec_refs = refs[1 + n_lstm:1 + n_lstm + n_dec]
        out_ref = refs[1 + n_lstm + n_dec]
        c_out = out_ref.shape[-1]

        # ---- load weights once (tiny; they stay resident in vregs/VMEM)
        wih0 = lstm_refs[0][...]                       # [I, 4H]
        whh0 = lstm_refs[1][...]                       # [H, 4H]
        b0 = jnp.broadcast_to(lstm_refs[2][...], (B, 4 * H))   # hoisted bcast
        wcat = []
        bcat = []
        for l in range(1, e_layers):
            wcat.append(lstm_refs[3 + 2 * (l - 1)][...])        # [2H, 4H]
            bcat.append(jnp.broadcast_to(lstm_refs[3 + 2 * (l - 1) + 1][...],
                                         (B, 4 * H)))

        # Static lane mask for the tanh ('g') gate block: lanes [2H, 3H).
        lane = lax.broadcasted_iota(jnp.int32, (B, 4 * H), 1)
        g_mask = (lane >= 2 * H) & (lane < 3 * H)

        def cell(gates, c_prev):
            # Full-width activations: 2 EUP passes (+1 select) instead of four
            # 32-lane EUP ops per step.  Gate order matches nn.LSTM: i, f, g, o.
            act = jnp.where(g_mask, jnp.tanh(gates), jax.nn.sigmoid(gates))
            i_g = act[:, 0 * H:1 * H]
            f_g = act[:, 1 * H:2 * H]
            g_g = act[:, 2 * H:3 * H]
            o_g = act[:, 3 * H:4 * H]
            c_new = f_g * c_prev + i_g * g_g
            h_new = o_g * jnp.tanh(c_new)
            return h_new, c_new

        L = e_layers
        h = [jnp.zeros((B, H), jnp.float32) for _ in range(L)]
        c = [jnp.zeros((B, H), jnp.float32) for _ in range(L)]

        x = x_ref[...].astype(jnp.float32)             # [B, T, I]

        # ---- wavefront-skewed, fully unrolled recurrence.
        # At outer step t, layer l handles timestep s = t - l.  Layers are
        # visited high -> low so h[l-1] still holds the PREVIOUS outer step's
        # value (= layer l-1's output at timestep s) when layer l reads it.
        # (Inter-layer dropout of nn.LSTM is identity at eval.)
        for t in range(T + L - 1):
            for l in reversed(range(L)):
                s = t - l
                if s < 0 or s >= T:
                    continue
                if l == 0:
                    x_t = x[:, s, :]                    # [B, I] static slice
                    # x_t @ W_ih is independent of the recurrence -> off the
                    # critical path; h @ W_hh is the serial chain.
                    gates = (jnp.dot(x_t, wih0,
                                     preferred_element_type=jnp.float32)
                             + jnp.dot(h[0], whh0,
                                       preferred_element_type=jnp.float32)
                             + b0)
                else:
                    inp = jnp.concatenate([h[l - 1], h[l]], axis=-1)  # [B, 2H]
                    gates = jnp.dot(inp, wcat[l - 1],
                                    preferred_element_type=jnp.float32) \
                            + bcat[l - 1]
                h[l], c[l] = cell(gates, c[l])

        # ---- decoder MLP on the top layer's final hidden state.
        # All pred_len decoder-input rows are identical (dropout = identity at
        # eval), so compute once per batch row and broadcast into the output.
        y = h[L - 1]
        for j, relu in enumerate(dec_relu):
            w = dec_refs[2 * j][...]                    # [in, out]
            bias = dec_refs[2 * j + 1][...]             # [1, out]
            y = jnp.dot(y, w, preferred_element_type=jnp.float32) + bias
            if relu:
                y = jnp.maximum(y, 0.0)

        out_ref[...] = jnp.broadcast_to(
            y[:, None, :], (B, pred_len, c_out)).astype(out_ref.dtype)

    return kernel


@functools.partial(jax.jit, static_argnums=(0, 1))
def _fused_forward(static_cfg, dec_relu, x_enc, *flat_params):
    e_layers, d_model, pred_len, c_out = static_cfg
    B, T, _ = x_enc.shape
    H = d_model

    kernel = _make_fused_kernel(B, T, H, e_layers, pred_len, dec_relu)
    n_in = 1 + len(flat_params)

    # No wrapper-side transpose/reshape/broadcast/slice: the kernel consumes
    # x_enc as-is and emits the final [B, pred_len, c_out] tensor.
    out = pl.pallas_call(
        kernel,
        out_shape=jax.ShapeDtypeStruct((B, pred_len, c_out), jnp.float32),
        in_specs=[pl.BlockSpec(memory_space=pltpu.MemorySpace.VMEM)] * n_in,
        out_specs=pl.BlockSpec(memory_space=pltpu.MemorySpace.VMEM),
    )(x_enc.astype(jnp.float32), *flat_params)
    return out


# ----------------------------------------------------------------------------
# Model config / params / wrappers
# ----------------------------------------------------------------------------
class Config:
    task_name = "long_term_forecast"
    pred_len = 4
    enc_in = 4
    d_model = 32
    e_layers = 2
    d_layers = 2
    d_ff = 64
    c_out = 4
    dropout = 0.1  # identity at inference


def init_params(cfg, key):
    params = {"lstm": [], "decoder": []}
    k = key
    bound = 1.0 / np.sqrt(cfg.d_model)

    in_size = cfg.enc_in
    for _ in range(cfg.e_layers):
        k, k1, k2, k3, k4 = jax.random.split(k, 5)
        params["lstm"].append({
            "w_ih": jax.random.uniform(k1, (4 * cfg.d_model, in_size),
                                       minval=-bound, maxval=bound, dtype=jnp.float32),
            "w_hh": jax.random.uniform(k2, (4 * cfg.d_model, cfg.d_model),
                                       minval=-bound, maxval=bound, dtype=jnp.float32),
            "b_ih": jax.random.uniform(k3, (4 * cfg.d_model,),
                                       minval=-bound, maxval=bound, dtype=jnp.float32),
            "b_hh": jax.random.uniform(k4, (4 * cfg.d_model,),
                                       minval=-bound, maxval=bound, dtype=jnp.float32),
        })
        in_size = cfg.d_model

    # decoder: (d_layers - 1) x [Linear -> ReLU -> Dropout], then Linear -> c_out
    in_size = cfg.d_model
    for _ in range(cfg.d_layers - 1):
        k, k1, k2 = jax.random.split(k, 3)
        b2 = 1.0 / np.sqrt(in_size)
        params["decoder"].append({
            "w": jax.random.uniform(k1, (cfg.d_ff, in_size),
                                    minval=-b2, maxval=b2, dtype=jnp.float32),
            "b": jax.random.uniform(k2, (cfg.d_ff,),
                                    minval=-b2, maxval=b2, dtype=jnp.float32),
            "relu": True,
        })
        in_size = cfg.d_ff
    k, k1, k2 = jax.random.split(k, 3)
    b2 = 1.0 / np.sqrt(in_size)
    params["decoder"].append({
        "w": jax.random.uniform(k1, (cfg.c_out, in_size),
                                minval=-b2, maxval=b2, dtype=jnp.float32),
        "b": jax.random.uniform(k2, (cfg.c_out,),
                                minval=-b2, maxval=b2, dtype=jnp.float32),
        "relu": False,
    })
    return params


def prepare_params(cfg, params):
    """One-time host-side prep: transpose weights, sum LSTM biases, and for
    layers l>0 pre-concatenate [W_ih^T ; W_hh^T] into one [2H,4H] weight."""
    flat = []
    for l, lp in enumerate(params["lstm"]):
        b = (lp["b_ih"] + lp["b_hh"]).reshape(1, -1).astype(jnp.float32)
        if l == 0:
            flat.append(jnp.transpose(lp["w_ih"]).astype(jnp.float32))   # [I, 4H]
            flat.append(jnp.transpose(lp["w_hh"]).astype(jnp.float32))   # [H, 4H]
            flat.append(b)
        else:
            wcat = jnp.concatenate(
                [jnp.transpose(lp["w_ih"]), jnp.transpose(lp["w_hh"])],
                axis=0).astype(jnp.float32)                              # [2H, 4H]
            flat.append(wcat)
            flat.append(b)
    dec_relu = []
    for lyr in params["decoder"]:
        flat.append(jnp.transpose(lyr["w"]).astype(jnp.float32))         # [in, out]
        flat.append(lyr["b"].reshape(1, -1).astype(jnp.float32))
        dec_relu.append(bool(lyr["relu"]))
    return flat, tuple(dec_relu)


def model_forward(cfg, flat_params, dec_relu, x_enc,
                  x_mark_enc=None, x_dec=None, x_mark_dec=None):
    static_cfg = (cfg.e_layers, cfg.d_model, cfg.pred_len, cfg.c_out)
    dec_out = _fused_forward(static_cfg, dec_relu, x_enc, *flat_params)
    # PyTorch's dec_out[:, -pred_len:, :] is the identity here: the kernel
    # already emits exactly pred_len rows.
    return dec_out


# ----------------------------------------------------------------------------
# Pure-JAX reference (for correctness check)
# ----------------------------------------------------------------------------
def _ref_lstm_layer(x, w_ih, w_hh, b_ih, b_hh):
    B, T, _ = x.shape
    H = w_hh.shape[1]

    def step(carry, x_t):
        h, c = carry
        gates = x_t @ w_ih.T + b_ih + h @ w_hh.T + b_hh
        i = jax.nn.sigmoid(gates[:, 0 * H:1 * H])
        f = jax.nn.sigmoid(gates[:, 1 * H:2 * H])
        g = jnp.tanh(gates[:, 2 * H:3 * H])
        o = jax.nn.sigmoid(gates[:, 3 * H:4 * H])
        c = f * c + i * g
        h = o * jnp.tanh(c)
        return (h, c), h

    init = (jnp.zeros((B, H), jnp.float32), jnp.zeros((B, H), jnp.float32))
    _, ys = lax.scan(step, init, jnp.swapaxes(x, 0, 1))
    return jnp.swapaxes(ys, 0, 1)


def ref_forward(cfg, params, x_enc):
    h_seq = x_enc
    for lp in params["lstm"]:
        h_seq = _ref_lstm_layer(h_seq, lp["w_ih"], lp["w_hh"], lp["b_ih"], lp["b_hh"])
    last_hidden = h_seq[:, -1, :]
    B = x_enc.shape[0]
    dec_in = jnp.broadcast_to(last_hidden[:, None, :],
                              (B, cfg.pred_len, cfg.d_model)).reshape(
                                  B * cfg.pred_len, cfg.d_model)
    out = dec_in
    for lyr in params["decoder"]:
        out = out @ lyr["w"].T + lyr["b"]
        if lyr["relu"]:
            out = jnp.maximum(out, 0.0)
    out = out.reshape(B, cfg.pred_len, -1)
    return out[:, -cfg.pred_len:, :]


if __name__ == "__main__":
    cfg = Config()
    key = jax.random.PRNGKey(0)
    k_param, k_x = jax.random.split(key)

    params = init_params(cfg, k_param)
    flat_params, dec_relu = prepare_params(cfg, params)

    B, T = 2, 8
    x_enc = jax.random.normal(k_x, (B, T, cfg.enc_in), dtype=jnp.float32)
    # x_mark_enc / x_dec / x_mark_dec are unused by the forecast path
    x_mark_enc = x_dec = x_mark_dec = None

    out = model_forward(cfg, flat_params, dec_relu, x_enc,
                        x_mark_enc, x_dec, x_mark_dec)
    out = jax.block_until_ready(out)

    ref = jax.block_until_ready(ref_forward(cfg, params, x_enc))
    np.testing.assert_allclose(np.asarray(out), np.asarray(ref),
                               rtol=1e-4, atol=1e-4)
    assert out.shape == (B, cfg.pred_len, cfg.c_out)
    print("KERNEL_OK")
</pallas_src>

<mosaic_0001>
module attributes {stable_mosaic.version = 11 : i64} {
  func.func @kernel(%arg0: memref<2x8x4xf32, #tpu.memory_space<vmem>>, %arg1: memref<4x128xf32, #tpu.memory_space<vmem>>, %arg2: memref<32x128xf32, #tpu.memory_space<vmem>>, %arg3: memref<1x128xf32, #tpu.memory_space<vmem>>, %arg4: memref<64x128xf32, #tpu.memory_space<vmem>>, %arg5: memref<1x128xf32, #tpu.memory_space<vmem>>, %arg6: memref<32x64xf32, #tpu.memory_space<vmem>>, %arg7: memref<1x64xf32, #tpu.memory_space<vmem>>, %arg8: memref<64x4xf32, #tpu.memory_space<vmem>>, %arg9: memref<1x4xf32, #tpu.memory_space<vmem>>, %arg10: memref<2x4x4xf32, #tpu.memory_space<vmem>>) attributes {dimension_semantics = [], scalar_prefetch = 0 : i64, scratch_operands = 0 : i64, tpu.core_type = #tpu.core_type<tc>} {
    %c0 = arith.constant 0 : index
    %c0_0 = arith.constant 0 : index
    %0 = vector.load %arg1[%c0, %c0_0] : memref<4x128xf32, #tpu.memory_space<vmem>>, vector<4x128xf32>
    %c0_1 = arith.constant 0 : index
    %c0_2 = arith.constant 0 : index
    %1 = vector.load %arg2[%c0_1, %c0_2] : memref<32x128xf32, #tpu.memory_space<vmem>>, vector<32x128xf32>
    %c0_3 = arith.constant 0 : index
    %c0_4 = arith.constant 0 : index
    %2 = vector.load %arg3[%c0_3, %c0_4] : memref<1x128xf32, #tpu.memory_space<vmem>>, vector<1x128xf32>
    %3 = vector.shape_cast %2 : vector<1x128xf32> to vector<1x128xf32>
    %4 = vector.broadcast %3 : vector<1x128xf32> to vector<2x128xf32>
    %c0_5 = arith.constant 0 : index
    %c0_6 = arith.constant 0 : index
    %5 = vector.load %arg4[%c0_5, %c0_6] : memref<64x128xf32, #tpu.memory_space<vmem>>, vector<64x128xf32>
    %c0_7 = arith.constant 0 : index
    %c0_8 = arith.constant 0 : index
    %6 = vector.load %arg5[%c0_7, %c0_8] : memref<1x128xf32, #tpu.memory_space<vmem>>, vector<1x128xf32>
    %7 = vector.shape_cast %6 : vector<1x128xf32> to vector<1x128xf32>
    %8 = vector.broadcast %7 : vector<1x128xf32> to vector<2x128xf32>
    %9 = tpu.iota {dimensions = array<i32: 1>} : vector<2x128xi32>
    %c64_i32 = arith.constant 64 : i32
    %10 = vector.broadcast %c64_i32 : i32 to vector<2x128xi32>
    %11 = arith.cmpi sge, %9, %10 : vector<2x128xi32>
    %c96_i32 = arith.constant 96 : i32
    %12 = vector.broadcast %c96_i32 : i32 to vector<2x128xi32>
    %13 = arith.cmpi slt, %9, %12 : vector<2x128xi32>
    %14 = arith.andi %11, %13 : vector<2x128xi1>
    %cst = arith.constant 0.000000e+00 : f32
    %15 = vector.broadcast %cst : f32 to vector<2x32xf32>
    %cst_9 = arith.constant 0.000000e+00 : f32
    %16 = vector.broadcast %cst_9 : f32 to vector<2x32xf32>
    %cst_10 = arith.constant 0.000000e+00 : f32
    %17 = vector.broadcast %cst_10 : f32 to vector<2x32xf32>
    %cst_11 = arith.constant 0.000000e+00 : f32
    %18 = vector.broadcast %cst_11 : f32 to vector<2x32xf32>
    %c0_12 = arith.constant 0 : index
    %c0_13 = arith.constant 0 : index
    %c0_14 = arith.constant 0 : index
    %19 = vector.load %arg0[%c0_12, %c0_13, %c0_14] : memref<2x8x4xf32, #tpu.memory_space<vmem>>, vector<2x8x4xf32>
    %20 = vector.extract_strided_slice %19 {offsets = [0, 0, 0], sizes = [2, 1, 4], strides = [1, 1, 1]} : vector<2x8x4xf32> to vector<2x1x4xf32>
    %21 = vector.shape_cast %20 : vector<2x1x4xf32> to vector<2x4xf32>
    %cst_15 = arith.constant dense<0.000000e+00> : vector<2x128xf32>
    %22 = tpu.matmul %21, %0, %cst_15 {dimension_numbers = #tpu.dot_dimension_numbers<[1], [0], [0], [1], [0, 0, 1, 1], [], []>} : vector<2x4xf32>, vector<4x128xf32>, vector<2x128xf32> -> vector<2x128xf32>
    %cst_16 = arith.constant dense<0.000000e+00> : vector<2x128xf32>
    %23 = tpu.matmul %15, %1, %cst_16 {dimension_numbers = #tpu.dot_dimension_numbers<[1], [0], [0], [1], [0, 0, 1, 1], [], []>} : vector<2x32xf32>, vector<32x128xf32>, vector<2x128xf32> -> vector<2x128xf32>
    %24 = arith.addf %22, %23 : vector<2x128xf32>
    %25 = arith.addf %24, %4 : vector<2x128xf32>
    %26 = math.tanh %25 : vector<2x128xf32>
    %27 = arith.negf %25 : vector<2x128xf32>
    %28 = math.exp %27 : vector<2x128xf32>
    %cst_17 = arith.constant 1.000000e+00 : f32
    %29 = vector.broadcast %cst_17 : f32 to vector<2x128xf32>
    %30 = arith.addf %29, %28 : vector<2x128xf32>
    %31 = arith.divf %29, %30 : vector<2x128xf32>
    %32 = arith.select %14, %26, %31 : vector<2x128xi1>, vector<2x128xf32>
    %33 = vector.extract_strided_slice %32 {offsets = [0, 0], sizes = [2, 32], strides = [1, 1]} : vector<2x128xf32> to vector<2x32xf32>
    %34 = vector.extract_strided_slice %32 {offsets = [0, 32], sizes = [2, 32], strides = [1, 1]} : vector<2x128xf32> to vector<2x32xf32>
    %35 = vector.extract_strided_slice %32 {offsets = [0, 64], sizes = [2, 32], strides = [1, 1]} : vector<2x128xf32> to vector<2x32xf32>
    %36 = vector.extract_strided_slice %32 {offsets = [0, 96], sizes = [2, 32], strides = [1, 1]} : vector<2x128xf32> to vector<2x32xf32>
    %37 = arith.mulf %34, %17 : vector<2x32xf32>
    %38 = arith.mulf %33, %35 : vector<2x32xf32>
    %39 = arith.addf %37, %38 : vector<2x32xf32>
    %40 = math.tanh %39 : vector<2x32xf32>
    %41 = arith.mulf %36, %40 : vector<2x32xf32>
    %42 = tpu.concatenate %41, %16 in 1 : vector<2x32xf32>, vector<2x32xf32> -> vector<2x64xf32>
    %cst_18 = arith.constant dense<0.000000e+00> : vector<2x128xf32>
    %43 = tpu.matmul %42, %5, %cst_18 {dimension_numbers = #tpu.dot_dimension_numbers<[1], [0], [0], [1], [0, 0, 1, 1], [], []>} : vector<2x64xf32>, vector<64x128xf32>, vector<2x128xf32> -> vector<2x128xf32>
    %44 = arith.addf %43, %8 : vector<2x128xf32>
    %45 = math.tanh %44 : vector<2x128xf32>
    %46 = arith.negf %44 : vector<2x128xf32>
    %47 = math.exp %46 : vector<2x128xf32>
    %cst_19 = arith.constant 1.000000e+00 : f32
    %48 = vector.broadcast %cst_19 : f32 to vector<2x128xf32>
    %49 = arith.addf %48, %47 : vector<2x128xf32>
    %50 = arith.divf %48, %49 : vector<2x128xf32>
    %51 = arith.select %14, %45, %50 : vector<2x128xi1>, vector<2x128xf32>
    %52 = vector.extract_strided_slice %51 {offsets = [0, 0], sizes = [2, 32], strides = [1, 1]} : vector<2x128xf32> to vector<2x32xf32>
    %53 = vector.extract_strided_slice %51 {offsets = [0, 32], sizes = [2, 32], strides = [1, 1]} : vector<2x128xf32> to vector<2x32xf32>
    %54 = vector.extract_strided_slice %51 {offsets = [0, 64], sizes = [2, 32], strides = [1, 1]} : vector<2x128xf32> to vector<2x32xf32>
    %55 = vector.extract_strided_slice %51 {offsets = [0, 96], sizes = [2, 32], strides = [1, 1]} : vector<2x128xf32> to vector<2x32xf32>
    %56 = arith.mulf %53, %18 : vector<2x32xf32>
    %57 = arith.mulf %52, %54 : vector<2x32xf32>
    %58 = arith.addf %56, %57 : vector<2x32xf32>
    %59 = math.tanh %58 : vector<2x32xf32>
    %60 = arith.mulf %55, %59 : vector<2x32xf32>
    %61 = vector.extract_strided_slice %19 {offsets = [0, 1, 0], sizes = [2, 1, 4], strides = [1, 1, 1]} : vector<2x8x4xf32> to vector<2x1x4xf32>
    %62 = vector.shape_cast %61 : vector<2x1x4xf32> to vector<2x4xf32>
    %cst_20 = arith.constant dense<0.000000e+00> : vector<2x128xf32>
    %63 = tpu.matmul %62, %0, %cst_20 {dimension_numbers = #tpu.dot_dimension_numbers<[1], [0], [0], [1], [0, 0, 1, 1], [], []>} : vector<2x4xf32>, vector<4x128xf32>, vector<2x128xf32> -> vector<2x128xf32>
    %cst_21 = arith.constant dense<0.000000e+00> : vector<2x128xf32>
    %64 = tpu.matmul %41, %1, %cst_21 {dimension_numbers = #tpu.dot_dimension_numbers<[1], [0], [0], [1], [0, 0, 1, 1], [], []>} : vector<2x32xf32>, vector<32x128xf32>, vector<2x128xf32> -> vector<2x128xf32>
    %65 = arith.addf %63, %64 : vector<2x128xf32>
    %66 = arith.addf %65, %4 : vector<2x128xf32>
    %67 = math.tanh %66 : vector<2x128xf32>
    %68 = arith.negf %66 : vector<2x128xf32>
    %69 = math.exp %68 : vector<2x128xf32>
    %cst_22 = arith.constant 1.000000e+00 : f32
    %70 = vector.broadcast %cst_22 : f32 to vector<2x128xf32>
    %71 = arith.addf %70, %69 : vector<2x128xf32>
    %72 = arith.divf %70, %71 : vector<2x128xf32>
    %73 = arith.select %14, %67, %72 : vector<2x128xi1>, vector<2x128xf32>
    %74 = vector.extract_strided_slice %73 {offsets = [0, 0], sizes = [2, 32], strides = [1, 1]} : vector<2x128xf32> to vector<2x32xf32>
    %75 = vector.extract_strided_slice %73 {offsets = [0, 32], sizes = [2, 32], strides = [1, 1]} : vector<2x128xf32> to vector<2x32xf32>
    %76 = vector.extract_strided_slice %73 {offsets = [0, 64], sizes = [2, 32], strides = [1, 1]} : vector<2x128xf32> to vector<2x32xf32>
    %77 = vector.extract_strided_slice %73 {offsets = [0, 96], sizes = [2, 32], strides = [1, 1]} : vector<2x128xf32> to vector<2x32xf32>
    %78 = arith.mulf %75, %39 : vector<2x32xf32>
    %79 = arith.mulf %74, %76 : vector<2x32xf32>
    %80 = arith.addf %78, %79 : vector<2x32xf32>
    %81 = math.tanh %80 : vector<2x32xf32>
    %82 = arith.mulf %77, %81 : vector<2x32xf32>
    %83 = tpu.concatenate %82, %60 in 1 : vector<2x32xf32>, vector<2x32xf32> -> vector<2x64xf32>
    %cst_23 = arith.constant dense<0.000000e+00> : vector<2x128xf32>
    %84 = tpu.matmul %83, %5, %cst_23 {dimension_numbers = #tpu.dot_dimension_numbers<[1], [0], [0], [1], [0, 0, 1, 1], [], []>} : vector<2x64xf32>, vector<64x128xf32>, vector<2x128xf32> -> vector<2x128xf32>
    %85 = arith.addf %84, %8 : vector<2x128xf32>
    %86 = math.tanh %85 : vector<2x128xf32>
    %87 = arith.negf %85 : vector<2x128xf32>
    %88 = math.exp %87 : vector<2x128xf32>
    %cst_24 = arith.constant 1.000000e+00 : f32
    %89 = vector.broadcast %cst_24 : f32 to vector<2x128xf32>
    %90 = arith.addf %89, %88 : vector<2x128xf32>
    %91 = arith.divf %89, %90 : vector<2x128xf32>
    %92 = arith.select %14, %86, %91 : vector<2x128xi1>, vector<2x128xf32>
    %93 = vector.extract_strided_slice %92 {offsets = [0, 0], sizes = [2, 32], strides = [1, 1]} : vector<2x128xf32> to vector<2x32xf32>
    %94 = vector.extract_strided_slice %92 {offsets = [0, 32], sizes = [2, 32], strides = [1, 1]} : vector<2x128xf32> to vector<2x32xf32>
    %95 = vector.extract_strided_slice %92 {offsets = [0, 64], sizes = [2, 32], strides = [1, 1]} : vector<2x128xf32> to vector<2x32xf32>
    %96 = vector.extract_strided_slice %92 {offsets = [0, 96], sizes = [2, 32], strides = [1, 1]} : vector<2x128xf32> to vector<2x32xf32>
    %97 = arith.mulf %94, %58 : vector<2x32xf32>
    %98 = arith.mulf %93, %95 : vector<2x32xf32>
    %99 = arith.addf %97, %98 : vector<2x32xf32>
    %100 = math.tanh %99 : vector<2x32xf32>
    %101 = arith.mulf %96, %100 : vector<2x32xf32>
    %102 = vector.extract_strided_slice %19 {offsets = [0, 2, 0], sizes = [2, 1, 4], strides = [1, 1, 1]} : vector<2x8x4xf32> to vector<2x1x4xf32>
    %103 = vector.shape_cast %102 : vector<2x1x4xf32> to vector<2x4xf32>
    %cst_25 = arith.constant dense<0.000000e+00> : vector<2x128xf32>
    %104 = tpu.matmul %103, %0, %cst_25 {dimension_numbers = #tpu.dot_dimension_numbers<[1], [0], [0], [1], [0, 0, 1, 1], [], []>} : vector<2x4xf32>, vector<4x128xf32>, vector<2x128xf32> -> vector<2x128xf32>
    %cst_26 = arith.constant dense<0.000000e+00> : vector<2x128xf32>
    %105 = tpu.matmul %82, %1, %cst_26 {dimension_numbers = #tpu.dot_dimension_numbers<[1], [0], [0], [1], [0, 0, 1, 1], [], []>} : vector<2x32xf32>, vector<32x128xf32>, vector<2x128xf32> -> vector<2x128xf32>
    %106 = arith.addf %104, %105 : vector<2x128xf32>
    %107 = arith.addf %106, %4 : vector<2x128xf32>
    %108 = math.tanh %107 : vector<2x128xf32>
    %109 = arith.negf %107 : vector<2x128xf32>
    %110 = math.exp %109 : vector<2x128xf32>
    %cst_27 = arith.constant 1.000000e+00 : f32
    %111 = vector.broadcast %cst_27 : f32 to vector<2x128xf32>
    %112 = arith.addf %111, %110 : vector<2x128xf32>
    %113 = arith.divf %111, %112 : vector<2x128xf32>
    %114 = arith.select %14, %108, %113 : vector<2x128xi1>, vector<2x128xf32>
    %115 = vector.extract_strided_slice %114 {offsets = [0, 0], sizes = [2, 32], strides = [1, 1]} : vector<2x128xf32> to vector<2x32xf32>
    %116 = vector.extract_strided_slice %114 {offsets = [0, 32], sizes = [2, 32], strides = [1, 1]} : vector<2x128xf32> to vector<2x32xf32>
    %117 = vector.extract_strided_slice %114 {offsets = [0, 64], sizes = [2, 32], strides = [1, 1]} : vector<2x128xf32> to vector<2x32xf32>
    %118 = vector.extract_strided_slice %114 {offsets = [0, 96], sizes = [2, 32], strides = [1, 1]} : vector<2x128xf32> to vector<2x32xf32>
    %119 = arith.mulf %116, %80 : vector<2x32xf32>
    %120 = arith.mulf %115, %117 : vector<2x32xf32>
    %121 = arith.addf %119, %120 : vector<2x32xf32>
    %122 = math.tanh %121 : vector<2x32xf32>
    %123 = arith.mulf %118, %122 : vector<2x32xf32>
    %124 = tpu.concatenate %123, %101 in 1 : vector<2x32xf32>, vector<2x32xf32> -> vector<2x64xf32>
    %cst_28 = arith.constant dense<0.000000e+00> : vector<2x128xf32>
    %125 = tpu.matmul %124, %5, %cst_28 {dimension_numbers = #tpu.dot_dimension_numbers<[1], [0], [0], [1], [0, 0, 1, 1], [], []>} : vector<2x64xf32>, vector<64x128xf32>, vector<2x128xf32> -> vector<2x128xf32>
    %126 = arith.addf %125, %8 : vector<2x128xf32>
    %127 = math.tanh %126 : vector<2x128xf32>
    %128 = arith.negf %126 : vector<2x128xf32>
    %129 = math.exp %128 : vector<2x128xf32>
    %cst_29 = arith.constant 1.000000e+00 : f32
    %130 = vector.broadcast %cst_29 : f32 to vector<2x128xf32>
    %131 = arith.addf %130, %129 : vector<2x128xf32>
    %132 = arith.divf %130, %131 : vector<2x128xf32>
    %133 = arith.select %14, %127, %132 : vector<2x128xi1>, vector<2x128xf32>
    %134 = vector.extract_strided_slice %133 {offsets = [0, 0], sizes = [2, 32], strides = [1, 1]} : vector<2x128xf32> to vector<2x32xf32>
    %135 = vector.extract_strided_slice %133 {offsets = [0, 32], sizes = [2, 32], strides = [1, 1]} : vector<2x128xf32> to vector<2x32xf32>
    %136 = vector.extract_strided_slice %133 {offsets = [0, 64], sizes = [2, 32], strides = [1, 1]} : vector<2x128xf32> to vector<2x32xf32>
    %137 = vector.extract_strided_slice %133 {offsets = [0, 96], sizes = [2, 32], strides = [1, 1]} : vector<2x128xf32> to vector<2x32xf32>
    %138 = arith.mulf %135, %99 : vector<2x32xf32>
    %139 = arith.mulf %134, %136 : vector<2x32xf32>
    %140 = arith.addf %138, %139 : vector<2x32xf32>
    %141 = math.tanh %140 : vector<2x32xf32>
    %142 = arith.mulf %137, %141 : vector<2x32xf32>
    %143 = vector.extract_strided_slice %19 {offsets = [0, 3, 0], sizes = [2, 1, 4], strides = [1, 1, 1]} : vector<2x8x4xf32> to vector<2x1x4xf32>
    %144 = vector.shape_cast %143 : vector<2x1x4xf32> to vector<2x4xf32>
    %cst_30 = arith.constant dense<0.000000e+00> : vector<2x128xf32>
    %145 = tpu.matmul %144, %0, %cst_30 {dimension_numbers = #tpu.dot_dimension_numbers<[1], [0], [0], [1], [0, 0, 1, 1], [], []>} : vector<2x4xf32>, vector<4x128xf32>, vector<2x128xf32> -> vector<2x128xf32>
    %cst_31 = arith.constant dense<0.000000e+00> : vector<2x128xf32>
    %146 = tpu.matmul %123, %1, %cst_31 {dimension_numbers = #tpu.dot_dimension_numbers<[1], [0], [0], [1], [0, 0, 1, 1], [], []>} : vector<2x32xf32>, vector<32x128xf32>, vector<2x128xf32> -> vector<2x128xf32>
    %147 = arith.addf %145, %146 : vector<2x128xf32>
    %148 = arith.addf %147, %4 : vector<2x128xf32>
    %149 = math.tanh %148 : vector<2x128xf32>
    %150 = arith.negf %148 : vector<2x128xf32>
    %151 = math.exp %150 : vector<2x128xf32>
    %cst_32 = arith.constant 1.000000e+00 : f32
    %152 = vector.broadcast %cst_32 : f32 to vector<2x128xf32>
    %153 = arith.addf %152, %151 : vector<2x128xf32>
    %154 = arith.divf %152, %153 : vector<2x128xf32>
    %155 = arith.select %14, %149, %154 : vector<2x128xi1>, vector<2x128xf32>
    %156 = vector.extract_strided_slice %155 {offsets = [0, 0], sizes = [2, 32], strides = [1, 1]} : vector<2x128xf32> to vector<2x32xf32>
    %157 = vector.extract_strided_slice %155 {offsets = [0, 32], sizes = [2, 32], strides = [1, 1]} : vector<2x128xf32> to vector<2x32xf32>
    %158 = vector.extract_strided_slice %155 {offsets = [0, 64], sizes = [2, 32], strides = [1, 1]} : vector<2x128xf32> to vector<2x32xf32>
    %159 = vector.extract_strided_slice %155 {offsets = [0, 96], sizes = [2, 32], strides = [1, 1]} : vector<2x128xf32> to vector<2x32xf32>
    %160 = arith.mulf %157, %121 : vector<2x32xf32>
    %161 = arith.mulf %156, %158 : vector<2x32xf32>
    %162 = arith.addf %160, %161 : vector<2x32xf32>
    %163 = math.tanh %162 : vector<2x32xf32>
    %164 = arith.mulf %159, %163 : vector<2x32xf32>
    %165 = tpu.concatenate %164, %142 in 1 : vector<2x32xf32>, vector<2x32xf32> -> vector<2x64xf32>
    %cst_33 = arith.constant dense<0.000000e+00> : vector<2x128xf32>
    %166 = tpu.matmul %165, %5, %cst_33 {dimension_numbers = #tpu.dot_dimension_numbers<[1], [0], [0], [1], [0, 0, 1, 1], [], []>} : vector<2x64xf32>, vector<64x128xf32>, vector<2x128xf32> -> vector<2x128xf32>
    %167 = arith.addf %166, %8 : vector<2x128xf32>
    %168 = math.tanh %167 : vector<2x128xf32>
    %169 = arith.negf %167 : vector<2x128xf32>
    %170 = math.exp %169 : vector<2x128xf32>
    %cst_34 = arith.constant 1.000000e+00 : f32
    %171 = vector.broadcast %cst_34 : f32 to vector<2x128xf32>
    %172 = arith.addf %171, %170 : vector<2x128xf32>
    %173 = arith.divf %171, %172 : vector<2x128xf32>
    %174 = arith.select %14, %168, %173 : vector<2x128xi1>, vector<2x128xf32>
    %175 = vector.extract_strided_slice %174 {offsets = [0, 0], sizes = [2, 32], strides = [1, 1]} : vector<2x128xf32> to vector<2x32xf32>
    %176 = vector.extract_strided_slice %174 {offsets = [0, 32], sizes = [2, 32], strides = [1, 1]} : vector<2x128xf32> to vector<2x32xf32>
    %177 = vector.extract_strided_slice %174 {offsets = [0, 64], sizes = [2, 32], strides = [1, 1]} : vector<2x128xf32> to vector<2x32xf32>
    %178 = vector.extract_strided_slice %174 {offsets = [0, 96], sizes = [2, 32], strides = [1, 1]} : vector<2x128xf32> to vector<2x32xf32>
    %179 = arith.mulf %176, %140 : vector<2x32xf32>
    %180 = arith.mulf %175, %177 : vector<2x32xf32>
    %181 = arith.addf %179, %180 : vector<2x32xf32>
    %182 = math.tanh %181 : vector<2x32xf32>
    %183 = arith.mulf %178, %182 : vector<2x32xf32>
    %184 = vector.extract_strided_slice %19 {offsets = [0, 4, 0], sizes = [2, 1, 4], strides = [1, 1, 1]} : vector<2x8x4xf32> to vector<2x1x4xf32>
    %185 = vector.shape_cast %184 : vector<2x1x4xf32> to vector<2x4xf32>
    %cst_35 = arith.constant dense<0.000000e+00> : vector<2x128xf32>
    %186 = tpu.matmul %185, %0, %cst_35 {dimension_numbers = #tpu.dot_dimension_numbers<[1], [0], [0], [1], [0, 0, 1, 1], [], []>} : vector<2x4xf32>, vector<4x128xf32>, vector<2x128xf32> -> vector<2x128xf32>
    %cst_36 = arith.constant dense<0.000000e+00> : vector<2x128xf32>
    %187 = tpu.matmul %164, %1, %cst_36 {dimension_numbers = #tpu.dot_dimension_numbers<[1], [0], [0], [1], [0, 0, 1, 1], [], []>} : vector<2x32xf32>, vector<32x128xf32>, vector<2x128xf32> -> vector<2x128xf32>
    %188 = arith.addf %186, %187 : vector<2x128xf32>
    %189 = arith.addf %188, %4 : vector<2x128xf32>
    %190 = math.tanh %189 : vector<2x128xf32>
    %191 = arith.negf %189 : vector<2x128xf32>
    %192 = math.exp %191 : vector<2x128xf32>
    %cst_37 = arith.constant 1.000000e+00 : f32
    %193 = vector.broadcast %cst_37 : f32 to vector<2x128xf32>
    %194 = arith.addf %193, %192 : vector<2x128xf32>
    %195 = arith.divf %193, %194 : vector<2x128xf32>
    %196 = arith.select %14, %190, %195 : vector<2x128xi1>, vector<2x128xf32>
    %197 = vector.extract_strided_slice %196 {offsets = [0, 0], sizes = [2, 32], strides = [1, 1]} : vector<2x128xf32> to vector<2x32xf32>
    %198 = vector.extract_strided_slice %196 {offsets = [0, 32], sizes = [2, 32], strides = [1, 1]} : vector<2x128xf32> to vector<2x32xf32>
    %199 = vector.extract_strided_slice %196 {offsets = [0, 64], sizes = [2, 32], strides = [1, 1]} : vector<2x128xf32> to vector<2x32xf32>
    %200 = vector.extract_strided_slice %196 {offsets = [0, 96], sizes = [2, 32], strides = [1, 1]} : vector<2x128xf32> to vector<2x32xf32>
    %201 = arith.mulf %198, %162 : vector<2x32xf32>
    %202 = arith.mulf %197, %199 : vector<2x32xf32>
    %203 = arith.addf %201, %202 : vector<2x32xf32>
    %204 = math.tanh %203 : vector<2x32xf32>
    %205 = arith.mulf %200, %204 : vector<2x32xf32>
    %206 = tpu.concatenate %205, %183 in 1 : vector<2x32xf32>, vector<2x32xf32> -> vector<2x64xf32>
    %cst_38 = arith.constant dense<0.000000e+00> : vector<2x128xf32>
    %207 = tpu.matmul %206, %5, %cst_38 {dimension_numbers = #tpu.dot_dimension_numbers<[1], [0], [0], [1], [0, 0, 1, 1], [], []>} : vector<2x64xf32>, vector<64x128xf32>, vector<2x128xf32> -> vector<2x128xf32>
    %208 = arith.addf %207, %8 : vector<2x128xf32>
    %209 = math.tanh %208 : vector<2x128xf32>
    %210 = arith.negf %208 : vector<2x128xf32>
    %211 = math.exp %210 : vector<2x128xf32>
    %cst_39 = arith.constant 1.000000e+00 : f32
    %212 = vector.broadcast %cst_39 : f32 to vector<2x128xf32>
    %213 = arith.addf %212, %211 : vector<2x128xf32>
    %214 = arith.divf %212, %213 : vector<2x128xf32>
    %215 = arith.select %14, %209, %214 : vector<2x128xi1>, vector<2x128xf32>
    %216 = vector.extract_strided_slice %215 {offsets = [0, 0], sizes = [2, 32], strides = [1, 1]} : vector<2x128xf32> to vector<2x32xf32>
    %217 = vector.extract_strided_slice %215 {offsets = [0, 32], sizes = [2, 32], strides = [1, 1]} : vector<2x128xf32> to vector<2x32xf32>
    %218 = vector.extract_strided_slice %215 {offsets = [0, 64], sizes = [2, 32], strides = [1, 1]} : vector<2x128xf32> to vector<2x32xf32>
    %219 = vector.extract_strided_slice %215 {offsets = [0, 96], sizes = [2, 32], strides = [1, 1]} : vector<2x128xf32> to vector<2x32xf32>
    %220 = arith.mulf %217, %181 : vector<2x32xf32>
    %221 = arith.mulf %216, %218 : vector<2x32xf32>
    %222 = arith.addf %220, %221 : vector<2x32xf32>
    %223 = math.tanh %222 : vector<2x32xf32>
    %224 = arith.mulf %219, %223 : vector<2x32xf32>
    %225 = vector.extract_strided_slice %19 {offsets = [0, 5, 0], sizes = [2, 1, 4], strides = [1, 1, 1]} : vector<2x8x4xf32> to vector<2x1x4xf32>
    %226 = vector.shape_cast %225 : vector<2x1x4xf32> to vector<2x4xf32>
    %cst_40 = arith.constant dense<0.000000e+00> : vector<2x128xf32>
    %227 = tpu.matmul %226, %0, %cst_40 {dimension_numbers = #tpu.dot_dimension_numbers<[1], [0], [0], [1], [0, 0, 1, 1], [], []>} : vector<2x4xf32>, vector<4x128xf32>, vector<2x128xf32> -> vector<2x128xf32>
    %cst_41 = arith.constant dense<0.000000e+00> : vector<2x128xf32>
    %228 = tpu.matmul %205, %1, %cst_41 {dimension_numbers = #tpu.dot_dimension_numbers<[1], [0], [0], [1], [0, 0, 1, 1], [], []>} : vector<2x32xf32>, vector<32x128xf32>, vector<2x128xf32> -> vector<2x128xf32>
    %229 = arith.addf %227, %228 : vector<2x128xf32>
    %230 = arith.addf %229, %4 : vector<2x128xf32>
    %231 = math.tanh %230 : vector<2x128xf32>
    %232 = arith.negf %230 : vector<2x128xf32>
    %233 = math.exp %232 : vector<2x128xf32>
    %cst_42 = arith.constant 1.000000e+00 : f32
    %234 = vector.broadcast %cst_42 : f32 to vector<2x128xf32>
    %235 = arith.addf %234, %233 : vector<2x128xf32>
    %236 = arith.divf %234, %235 : vector<2x128xf32>
    %237 = arith.select %14, %231, %236 : vector<2x128xi1>, vector<2x128xf32>
    %238 = vector.extract_strided_slice %237 {offsets = [0, 0], sizes = [2, 32], strides = [1, 1]} : vector<2x128xf32> to vector<2x32xf32>
    %239 = vector.extract_strided_slice %237 {offsets = [0, 32], sizes = [2, 32], strides = [1, 1]} : vector<2x128xf32> to vector<2x32xf32>
    %240 = vector.extract_strided_slice %237 {offsets = [0, 64], sizes = [2, 32], strides = [1, 1]} : vector<2x128xf32> to vector<2x32xf32>
    %241 = vector.extract_strided_slice %237 {offsets = [0, 96], sizes = [2, 32], strides = [1, 1]} : vector<2x128xf32> to vector<2x32xf32>
    %242 = arith.mulf %239, %203 : vector<2x32xf32>
    %243 = arith.mulf %238, %240 : vector<2x32xf32>
    %244 = arith.addf %242, %243 : vector<2x32xf32>
    %245 = math.tanh %244 : vector<2x32xf32>
    %246 = arith.mulf %241, %245 : vector<2x32xf32>
    %247 = tpu.concatenate %246, %224 in 1 : vector<2x32xf32>, vector<2x32xf32> -> vector<2x64xf32>
    %cst_43 = arith.constant dense<0.000000e+00> : vector<2x128xf32>
    %248 = tpu.matmul %247, %5, %cst_43 {dimension_numbers = #tpu.dot_dimension_numbers<[1], [0], [0], [1], [0, 0, 1, 1], [], []>} : vector<2x64xf32>, vector<64x128xf32>, vector<2x128xf32> -> vector<2x128xf32>
    %249 = arith.addf %248, %8 : vector<2x128xf32>
    %250 = math.tanh %249 : vector<2x128xf32>
    %251 = arith.negf %249 : vector<2x128xf32>
    %252 = math.exp %251 : vector<2x128xf32>
    %cst_44 = arith.constant 1.000000e+00 : f32
    %253 = vector.broadcast %cst_44 : f32 to vector<2x128xf32>
    %254 = arith.addf %253, %252 : vector<2x128xf32>
    %255 = arith.divf %253, %254 : vector<2x128xf32>
    %256 = arith.select %14, %250, %255 : vector<2x128xi1>, vector<2x128xf32>
    %257 = vector.extract_strided_slice %256 {offsets = [0, 0], sizes = [2, 32], strides = [1, 1]} : vector<2x128xf32> to vector<2x32xf32>
    %258 = vector.extract_strided_slice %256 {offsets = [0, 32], sizes = [2, 32], strides = [1, 1]} : vector<2x128xf32> to vector<2x32xf32>
    %259 = vector.extract_strided_slice %256 {offsets = [0, 64], sizes = [2, 32], strides = [1, 1]} : vector<2x128xf32> to vector<2x32xf32>
    %260 = vector.extract_strided_slice %256 {offsets = [0, 96], sizes = [2, 32], strides = [1, 1]} : vector<2x128xf32> to vector<2x32xf32>
    %261 = arith.mulf %258, %222 : vector<2x32xf32>
    %262 = arith.mulf %257, %259 : vector<2x32xf32>
    %263 = arith.addf %261, %262 : vector<2x32xf32>
    %264 = math.tanh %263 : vector<2x32xf32>
    %265 = arith.mulf %260, %264 : vector<2x32xf32>
    %266 = vector.extract_strided_slice %19 {offsets = [0, 6, 0], sizes = [2, 1, 4], strides = [1, 1, 1]} : vector<2x8x4xf32> to vector<2x1x4xf32>
    %267 = vector.shape_cast %266 : vector<2x1x4xf32> to vector<2x4xf32>
    %cst_45 = arith.constant dense<0.000000e+00> : vector<2x128xf32>
    %268 = tpu.matmul %267, %0, %cst_45 {dimension_numbers = #tpu.dot_dimension_numbers<[1], [0], [0], [1], [0, 0, 1, 1], [], []>} : vector<2x4xf32>, vector<4x128xf32>, vector<2x128xf32> -> vector<2x128xf32>
    %cst_46 = arith.constant dense<0.000000e+00> : vector<2x128xf32>
    %269 = tpu.matmul %246, %1, %cst_46 {dimension_numbers = #tpu.dot_dimension_numbers<[1], [0], [0], [1], [0, 0, 1, 1], [], []>} : vector<2x32xf32>, vector<32x128xf32>, vector<2x128xf32> -> vector<2x128xf32>
    %270 = arith.addf %268, %269 : vector<2x128xf32>
    %271 = arith.addf %270, %4 : vector<2x128xf32>
    %272 = math.tanh %271 : vector<2x128xf32>
    %273 = arith.negf %271 : vector<2x128xf32>
    %274 = math.exp %273 : vector<2x128xf32>
    %cst_47 = arith.constant 1.000000e+00 : f32
    %275 = vector.broadcast %cst_47 : f32 to vector<2x128xf32>
    %276 = arith.addf %275, %274 : vector<2x128xf32>
    %277 = arith.divf %275, %276 : vector<2x128xf32>
    %278 = arith.select %14, %272, %277 : vector<2x128xi1>, vector<2x128xf32>
    %279 = vector.extract_strided_slice %278 {offsets = [0, 0], sizes = [2, 32], strides = [1, 1]} : vector<2x128xf32> to vector<2x32xf32>
    %280 = vector.extract_strided_slice %278 {offsets = [0, 32], sizes = [2, 32], strides = [1, 1]} : vector<2x128xf32> to vector<2x32xf32>
    %281 = vector.extract_strided_slice %278 {offsets = [0, 64], sizes = [2, 32], strides = [1, 1]} : vector<2x128xf32> to vector<2x32xf32>
    %282 = vector.extract_strided_slice %278 {offsets = [0, 96], sizes = [2, 32], strides = [1, 1]} : vector<2x128xf32> to vector<2x32xf32>
    %283 = arith.mulf %280, %244 : vector<2x32xf32>
    %284 = arith.mulf %279, %281 : vector<2x32xf32>
    %285 = arith.addf %283, %284 : vector<2x32xf32>
    %286 = math.tanh %285 : vector<2x32xf32>
    %287 = arith.mulf %282, %286 : vector<2x32xf32>
    %288 = tpu.concatenate %287, %265 in 1 : vector<2x32xf32>, vector<2x32xf32> -> vector<2x64xf32>
    %cst_48 = arith.constant dense<0.000000e+00> : vector<2x128xf32>
    %289 = tpu.matmul %288, %5, %cst_48 {dimension_numbers = #tpu.dot_dimension_numbers<[1], [0], [0], [1], [0, 0, 1, 1], [], []>} : vector<2x64xf32>, vector<64x128xf32>, vector<2x128xf32> -> vector<2x128xf32>
    %290 = arith.addf %289, %8 : vector<2x128xf32>
    %291 = math.tanh %290 : vector<2x128xf32>
    %292 = arith.negf %290 : vector<2x128xf32>
    %293 = math.exp %292 : vector<2x128xf32>
    %cst_49 = arith.constant 1.000000e+00 : f32
    %294 = vector.broadcast %cst_49 : f32 to vector<2x128xf32>
    %295 = arith.addf %294, %293 : vector<2x128xf32>
    %296 = arith.divf %294, %295 : vector<2x128xf32>
    %297 = arith.select %14, %291, %296 : vector<2x128xi1>, vector<2x128xf32>
    %298 = vector.extract_strided_slice %297 {offsets = [0, 0], sizes = [2, 32], strides = [1, 1]} : vector<2x128xf32> to vector<2x32xf32>
    %299 = vector.extract_strided_slice %297 {offsets = [0, 32], sizes = [2, 32], strides = [1, 1]} : vector<2x128xf32> to vector<2x32xf32>
    %300 = vector.extract_strided_slice %297 {offsets = [0, 64], sizes = [2, 32], strides = [1, 1]} : vector<2x128xf32> to vector<2x32xf32>
    %301 = vector.extract_strided_slice %297 {offsets = [0, 96], sizes = [2, 32], strides = [1, 1]} : vector<2x128xf32> to vector<2x32xf32>
    %302 = arith.mulf %299, %263 : vector<2x32xf32>
    %303 = arith.mulf %298, %300 : vector<2x32xf32>
    %304 = arith.addf %302, %303 : vector<2x32xf32>
    %305 = math.tanh %304 : vector<2x32xf32>
    %306 = arith.mulf %301, %305 : vector<2x32xf32>
    %307 = vector.extract_strided_slice %19 {offsets = [0, 7, 0], sizes = [2, 1, 4], strides = [1, 1, 1]} : vector<2x8x4xf32> to vector<2x1x4xf32>
    %308 = vector.shape_cast %307 : vector<2x1x4xf32> to vector<2x4xf32>
    %cst_50 = arith.constant dense<0.000000e+00> : vector<2x128xf32>
    %309 = tpu.matmul %308, %0, %cst_50 {dimension_numbers = #tpu.dot_dimension_numbers<[1], [0], [0], [1], [0, 0, 1, 1], [], []>} : vector<2x4xf32>, vector<4x128xf32>, vector<2x128xf32> -> vector<2x128xf32>
    %cst_51 = arith.constant dense<0.000000e+00> : vector<2x128xf32>
    %310 = tpu.matmul %287, %1, %cst_51 {dimension_numbers = #tpu.dot_dimension_numbers<[1], [0], [0], [1], [0, 0, 1, 1], [], []>} : vector<2x32xf32>, vector<32x128xf32>, vector<2x128xf32> -> vector<2x128xf32>
    %311 = arith.addf %309, %310 : vector<2x128xf32>
    %312 = arith.addf %311, %4 : vector<2x128xf32>
    %313 = math.tanh %312 : vector<2x128xf32>
    %314 = arith.negf %312 : vector<2x128xf32>
    %315 = math.exp %314 : vector<2x128xf32>
    %cst_52 = arith.constant 1.000000e+00 : f32
    %316 = vector.broadcast %cst_52 : f32 to vector<2x128xf32>
    %317 = arith.addf %316, %315 : vector<2x128xf32>
    %318 = arith.divf %316, %317 : vector<2x128xf32>
    %319 = arith.select %14, %313, %318 : vector<2x128xi1>, vector<2x128xf32>
    %320 = vector.extract_strided_slice %319 {offsets = [0, 0], sizes = [2, 32], strides = [1, 1]} : vector<2x128xf32> to vector<2x32xf32>
    %321 = vector.extract_strided_slice %319 {offsets = [0, 32], sizes = [2, 32], strides = [1, 1]} : vector<2x128xf32> to vector<2x32xf32>
    %322 = vector.extract_strided_slice %319 {offsets = [0, 64], sizes = [2, 32], strides = [1, 1]} : vector<2x128xf32> to vector<2x32xf32>
    %323 = vector.extract_strided_slice %319 {offsets = [0, 96], sizes = [2, 32], strides = [1, 1]} : vector<2x128xf32> to vector<2x32xf32>
    %324 = arith.mulf %321, %285 : vector<2x32xf32>
    %325 = arith.mulf %320, %322 : vector<2x32xf32>
    %326 = arith.addf %324, %325 : vector<2x32xf32>
    %327 = math.tanh %326 : vector<2x32xf32>
    %328 = arith.mulf %323, %327 : vector<2x32xf32>
    %329 = tpu.concatenate %328, %306 in 1 : vector<2x32xf32>, vector<2x32xf32> -> vector<2x64xf32>
    %cst_53 = arith.constant dense<0.000000e+00> : vector<2x128xf32>
    %330 = tpu.matmul %329, %5, %cst_53 {dimension_numbers = #tpu.dot_dimension_numbers<[1], [0], [0], [1], [0, 0, 1, 1], [], []>} : vector<2x64xf32>, vector<64x128xf32>, vector<2x128xf32> -> vector<2x128xf32>
    %331 = arith.addf %330, %8 : vector<2x128xf32>
    %332 = math.tanh %331 : vector<2x128xf32>
    %333 = arith.negf %331 : vector<2x128xf32>
    %334 = math.exp %333 : vector<2x128xf32>
    %cst_54 = arith.constant 1.000000e+00 : f32
    %335 = vector.broadcast %cst_54 : f32 to vector<2x128xf32>
    %336 = arith.addf %335, %334 : vector<2x128xf32>
    %337 = arith.divf %335, %336 : vector<2x128xf32>
    %338 = arith.select %14, %332, %337 : vector<2x128xi1>, vector<2x128xf32>
    %339 = vector.extract_strided_slice %338 {offsets = [0, 0], sizes = [2, 32], strides = [1, 1]} : vector<2x128xf32> to vector<2x32xf32>
    %340 = vector.extract_strided_slice %338 {offsets = [0, 32], sizes = [2, 32], strides = [1, 1]} : vector<2x128xf32> to vector<2x32xf32>
    %341 = vector.extract_strided_slice %338 {offsets = [0, 64], sizes = [2, 32], strides = [1, 1]} : vector<2x128xf32> to vector<2x32xf32>
    %342 = vector.extract_strided_slice %338 {offsets = [0, 96], sizes = [2, 32], strides = [1, 1]} : vector<2x128xf32> to vector<2x32xf32>
    %343 = arith.mulf %340, %304 : vector<2x32xf32>
    %344 = arith.mulf %339, %341 : vector<2x32xf32>
    %345 = arith.addf %343, %344 : vector<2x32xf32>
    %346 = math.tanh %345 : vector<2x32xf32>
    %347 = arith.mulf %342, %346 : vector<2x32xf32>
    %c0_55 = arith.constant 0 : index
    %c0_56 = arith.constant 0 : index
    %348 = vector.load %arg6[%c0_55, %c0_56] : memref<32x64xf32, #tpu.memory_space<vmem>>, vector<32x64xf32>
    %c0_57 = arith.constant 0 : index
    %c0_58 = arith.constant 0 : index
    %349 = vector.load %arg7[%c0_57, %c0_58] : memref<1x64xf32, #tpu.memory_space<vmem>>, vector<1x64xf32>
    %cst_59 = arith.constant dense<0.000000e+00> : vector<2x64xf32>
    %350 = tpu.matmul %347, %348, %cst_59 {dimension_numbers = #tpu.dot_dimension_numbers<[1], [0], [0], [1], [0, 0, 1, 1], [], []>} : vector<2x32xf32>, vector<32x64xf32>, vector<2x64xf32> -> vector<2x64xf32>
    %351 = vector.broadcast %349 : vector<1x64xf32> to vector<2x64xf32>
    %352 = arith.addf %350, %351 : vector<2x64xf32>
    %cst_60 = arith.constant 0.000000e+00 : f32
    %353 = vector.broadcast %cst_60 : f32 to vector<2x64xf32>
    %354 = arith.maximumf %352, %353 : vector<2x64xf32>
    %c0_61 = arith.constant 0 : index
    %c0_62 = arith.constant 0 : index
    %355 = vector.load %arg8[%c0_61, %c0_62] : memref<64x4xf32, #tpu.memory_space<vmem>>, vector<64x4xf32>
    %c0_63 = arith.constant 0 : index
    %c0_64 = arith.constant 0 : index
    %356 = vector.load %arg9[%c0_63, %c0_64] : memref<1x4xf32, #tpu.memory_space<vmem>>, vector<1x4xf32>
    %cst_65 = arith.constant dense<0.000000e+00> : vector<2x4xf32>
    %357 = tpu.matmul %354, %355, %cst_65 {dimension_numbers = #tpu.dot_dimension_numbers<[1], [0], [0], [1], [0, 0, 1, 1], [], []>} : vector<2x64xf32>, vector<64x4xf32>, vector<2x4xf32> -> vector<2x4xf32>
    %358 = vector.broadcast %356 : vector<1x4xf32> to vector<2x4xf32>
    %359 = arith.addf %357, %358 : vector<2x4xf32>
    %360 = vector.shape_cast %359 : vector<2x4xf32> to vector<2x1x4xf32>
    %361 = vector.shape_cast %360 : vector<2x1x4xf32> to vector<2x1x4xf32>
    %362 = vector.broadcast %361 : vector<2x1x4xf32> to vector<2x4x4xf32>
    %c0_66 = arith.constant 0 : index
    %c0_67 = arith.constant 0 : index
    %c0_68 = arith.constant 0 : index
    %363 = vector.load %arg10[%c0_66, %c0_67, %c0_68] : memref<2x4x4xf32, #tpu.memory_space<vmem>>, vector<2x4x4xf32>
    tpu.vector_store %arg10[%c0_66, %c0_67, %c0_68], %362 {strides = array<i32>} : memref<2x4x4xf32, #tpu.memory_space<vmem>>, vector<2x4x4xf32>,
    return
  }
}

</mosaic_0001>

<bundles_post_ra>
// kernel: _fused_forward.1
= control target key start
LH: loop header
LB: loop body
LE: loop exit
PB: predicated region body
PF: predicated region fallthrough
CT: control target
= control target key end

     0   :  { %15 = vsyncpa [#allocation3], 0  ;;  %s2257_s0 = inlined_call_operand.vmem [shape: f32[2,8,4], index: 0, kind: input, shape index: {}]   ;;  %s2258_s1 = inlined_call_operand.vmem [shape: f32[4,128], index: 1, kind: input, shape index: {}]   ;;  %s2259_s2 = inlined_call_operand.hbm [shape: f32[32,128], index: 2, kind: input, shape index: {}]   ;;  %s2260_s3 = inlined_call_operand.vmem [shape: f32[1,128], index: 3, kind: input, shape index: {}]   ;;  %s2261_s4 = inlined_call_operand.vmem [shape: f32[64,128], index: 4, kind: input, shape index: {}]   ;;  %s2262_s5 = inlined_call_operand.vmem [shape: f32[1,128], index: 5, kind: input, shape index: {}]   ;;  %s2263_s6 = inlined_call_operand.hbm [shape: f32[32,64], index: 6, kind: input, shape index: {}]   ;;  %s2264_s7 = inlined_call_operand.vmem [shape: f32[1,64], index: 7, kind: input, shape index: {}]   ;;  %s2265_s8 = inlined_call_operand.vmem [shape: f32[64,4], index: 8, kind: input, shape index: {}]   ;;  %s2266_s9 = inlined_call_operand.vmem [shape: f32[1,4], index: 9, kind: input, shape index: {}]   ;;  %s2267_s10 = inlined_call_operand.hbm [shape: f32[2,4,4], index: 10, kind: output, shape index: {}]  }
   0x1   :  { %16 = vsyncpa [#allocation6], 0 }
   0x2   :  { %17 = vsyncpa [#allocation4], 0  ;;  %s26_s15 = sshll.u32 %s2259_s2, 4  ;;  %s1723_s16 = smov [#allocation2]   ;;  %s27_s15 = int_to_ptr.hbm [resolvable:$true] %s26_s15 }
   0x3   :  { %s28_s17 = sshll.u32 %s1723_s16, 4  ;;  %s45_s20 = sshll.u32 %s2263_s6, 4  ;;  %s29_s17 = int_to_ptr.vmem [resolvable:$true] %s28_s17  ;;  %s46_s20 = int_to_ptr.hbm [resolvable:$true] %s45_s20 }
   0x4   :  { %s1724_s21 = smov 128   ;;  %s1725_s22 = smov 8  }
   0x5   :  { %34 = dma.hbm_to_vmem [thread:$0]  %s27_s15, 512, %s29_s17, [#allocation3], %s1724_s21, %s1724_s21, %s1725_s22  }
   0x6   :  { %s1726_s23 = smov [#allocation5]  }
   0x7   :  { %s47_s24 = sshll.u32 %s1726_s23, 4  ;;  %s48_s24 = int_to_ptr.vmem [resolvable:$true] %s47_s24 }
   0x8   :  { %53 = dma.hbm_to_vmem [thread:$0]  %s46_s20, 512, %s48_s24, [#allocation6], %s1724_s21, %s1724_s21, %s1725_s22  }
   0x9   :  { %1717 = dma.done.wait [#allocation3], 512  }
   0xa   :  { %1718 = vsyncadd [#allocation3], 4294966784 }
   0xb   :  { %1719 = dma.done.wait [#allocation6], 512  }
   0xc   :  { %1720 = vsyncadd [#allocation6], 4294966784  ;;  %vm128_vm0 = vcmask 1043456   ;;  %v1793_v0 = vld [vmem:[#allocation2 + $0x18] sm:$0xff]  ;;  %v1798_v1 = vld [vmem:[%s2258_s1] sm:$0xf]  ;;  %v89_v18 = vlaneseq }
   0xd   :  { %112 = vmatpush.msra.mxu0 %v1793_v0  ;;  %1447 = vmatpush.msk.msra.mxu2 %vm128_vm0, %v1798_v1  ;;  %v1806_v2 = vld [vmem:[%s2257_s0] sm:$0xff]  ;;  %v1811_v3 = vld [vmem:[%s2257_s0 + $0x8] sm:$0xff]  ;;  %vm123_vm1 = vcmask 1041409   ;;  %vm125_vm2 = vcmask 31744   ;;  %v1813_v4 = vld [vmem:[#allocation2 + $0x10] sm:$0xff]  ;;  %v1727_v9 = vmov 0.0  }
   0xe   :  { %v122_v5 = vrot.slane %v1811_v3, 7  ;;  %v1816_v6 = vld [vmem:[#allocation2 + $0x8] sm:$0xff]  ;;  %272 = vmatpush.msra.mxu3 %v1793_v0  ;;  %1453 = vmatpush.msk.msra.mxu1 %vm128_vm0, %v1798_v1  ;;  %v1826_v8 = vld [vmem:[#allocation2] sm:$0xff]  ;;  %v90_v20 = vand.u32 127, %v89_v18  ;;  %s1728_s11 = smov 64   ;;  %s1729_s12 = smov 32  }
   0xf   :  { %113 = vmatpush.msra.mxu0 %v1813_v4  ;;  %v1841_v11 = vld [vmem:[%s2260_s3] ss:$0 sm:$0xff]  ;;  %v1859_v39 = vld [vmem:[%s2261_s4 + $0x38] sm:$0xff]  ;;  %v1864_v40 = vld [vmem:[%s2261_s4 + $0x30] sm:$0xff]  ;;  %v280_v49 = vrot.slane %v1806_v2, 1  ;;  %vm96_vm10 = vcmask 261120  }
  0x10   :  { %1459 = vmatpush.msk.msrb.mxu1 %vm128_vm0, %v1798_v1  ;;  %v124_v7 = vsel %vm123_vm1, %v122_v5, %v1806_v2  ;;  %273 = vmatpush.msra.mxu3 %v1813_v4  ;;  %vm91_vm3 = vcmp.ge.s32.totalorder %v90_v20, 64  ;;  %vm92_vm4 = vcmp.lt.s32.totalorder %v90_v20, 96  ;;  %v1871_v41 = vld [vmem:[%s2261_s4 + $0x28] sm:$0xff]  ;;  %v1878_v42 = vld [vmem:[%s2261_s4 + $0x20] sm:$0xff]  ;;  %v1885_v43 = vld [vmem:[%s2261_s4 + $0x18] sm:$0xff]  ;;  %vm196_vm11 = vcmask 523264  }
  0x11   :  { %1448 = vmatmul.msk.f32.vlgmr.msra.gmra.mxu2 %vm125_vm2, %v124_v7  ;;  %114 = vmatpush.msra.mxu0 %v1816_v6  ;;  %vm1844_vm6 = vmand %vm91_vm3, %vm92_vm4  ;;  %v1892_v44 = vld [vmem:[%s2261_s4 + $0x10] sm:$0xff]  ;;  %v1899_v45 = vld [vmem:[%s2261_s4 + $0x8] sm:$0xff]  ;;  %v281_v50 = vsel %vm123_vm1, %v1811_v3, %v280_v49  ;;  %s1730_s13 = smov [#allocation7]   ;;  %s1433_s15 = sshll.u32 %s2267_s10, 4  ;;  %s1434_s15 = int_to_ptr.hbm [resolvable:$true] %s1433_s15 }
  0x12   :  { %274 = vmatpush.msra.mxu3 %v1816_v6  ;;  %208 = vmatpush.msrb.mxu2 %v1859_v39  ;;  %v1909_v48 = vld [vmem:[%s2261_s4] sm:$0xff]  ;;  %s1431_s14 = sshll.u32 %s1730_s13, 4  ;;  %s1432_s14 = int_to_ptr.vmem [resolvable:$true] %s1431_s14 }
  0x13   :  { %115 = vmatpush.msra.mxu0 %v1826_v8  ;;  %1454 = vmatmul.msk.f32.vlgmr.msra.gmra.mxu1 %vm125_vm2, %v281_v50  ;;  %v1953_v54 = vld [vmem:[%s2262_s5] ss:$0 sm:$0xff] }
  0x14   :  { %116 = vmatmul.f32.vlgmr.msra.gmra.mxu0 %v1727_v9  ;;  %275 = vmatpush.msra.mxu3 %v1826_v8  ;;  %v1349_v26 = vld [vmem:[#allocation5] sm:$0xff] }
  0x15   :  { %363 = vmatpush.msrb.mxu0 %v1859_v39  ;;  %209 = vmatpush.msrb.mxu2 %v1864_v40 }
  0x16   :  { %427 = vmatpush.msrb.mxu3 %v1793_v0  ;;  %1465 = vmatpush.msk.msra.mxu1 %vm128_vm0, %v1798_v1 }
  0x17   :  { %364 = vmatpush.msrb.mxu0 %v1864_v40  ;;  %210 = vmatpush.msrb.mxu2 %v1871_v41 }
  0x18   :  { %428 = vmatpush.msrb.mxu3 %v1813_v4 }
  0x19   :  { %365 = vmatpush.msrb.mxu0 %v1871_v41  ;;  %211 = vmatpush.msrb.mxu2 %v1878_v42 }
  0x1a   :  { %429 = vmatpush.msrb.mxu3 %v1816_v6 }
  0x1b   :  { %366 = vmatpush.msrb.mxu0 %v1878_v42  ;;  %212 = vmatpush.msrb.mxu2 %v1885_v43 }
  0x1c   :  { %430 = vmatpush.msrb.mxu3 %v1826_v8 }
  0x1d   :  { %367 = vmatpush.msrb.mxu0 %v1885_v43  ;;  %213 = vmatpush.msrb.mxu2 %v1892_v44 }
  0x1f   :  { %368 = vmatpush.msrb.mxu0 %v1892_v44  ;;  %214 = vmatpush.msrb.mxu2 %v1899_v45 }
  0x21   :  { %369 = vmatpush.msrb.mxu0 %v1899_v45  ;;  %215 = vmatpush.msrb.mxu2 %v1909_v48 }
  0x23   :  { %370 = vmatpush.msrb.mxu0 %v1909_v48  ;;  %519 = vmatpush.msra.mxu2 %v1859_v39 }
  0x25   :  { %675 = vmatpush.msra.mxu0 %v1859_v39  ;;  %520 = vmatpush.msra.mxu2 %v1864_v40 }
  0x27   :  { %676 = vmatpush.msra.mxu0 %v1864_v40  ;;  %521 = vmatpush.msra.mxu2 %v1871_v41 }
  0x29   :  { %677 = vmatpush.msra.mxu0 %v1871_v41  ;;  %522 = vmatpush.msra.mxu2 %v1878_v42 }
  0x2b   :  { %678 = vmatpush.msra.mxu0 %v1878_v42  ;;  %523 = vmatpush.msra.mxu2 %v1885_v43 }
  0x2d   :  { %679 = vmatpush.msra.mxu0 %v1885_v43  ;;  %524 = vmatpush.msra.mxu2 %v1892_v44 }
  0x2f   :  { %680 = vmatpush.msra.mxu0 %v1892_v44  ;;  %525 = vmatpush.msra.mxu2 %v1899_v45 }
  0x31   :  { %681 = vmatpush.msra.mxu0 %v1899_v45  ;;  %526 = vmatpush.msra.mxu2 %v1909_v48 }
  0x33   :  { %682 = vmatpush.msra.mxu0 %v1909_v48 }
  0x90   :  { %v301_v53 = vpop.f32.mrf.mxu1 }
  0x91   :  { %v117_v10 = vpop.f32.mrf.mxu0 }
  0x94   :  { %v149_v12 = vpop.f32.mrf.mxu2 }
  0x95   :  { %v150_v13 = vadd.f32 %v149_v12, %v117_v10 }
  0x97   :  { %v152_v14 = vadd.f32 %v1841_v11, %v150_v13 }
  0x99   :  { %v1449_v15 = vmul.f32 -1.442695, %v152_v14 }
  0x9b   :  { %1509 = vpow2.f32 %v1449_v15 }
  0xa1   :  { %v1510_v16 = vpop.eup %1509 }
  0xa2   :  { %v157_v17 = vadd.f32 1.0, %v1510_v16 }
  0xa4   :  { %1511 = vrcp.f32 %v157_v17  ;;  %v169_v23 = vand.u32 2147483648, %v157_v17  ;;  %v167_v25 = vand.u32 2147483647, %v157_v17  ;;  %vm163_vm7 = vweird.f32 %v157_v17 }
  0xa5   :  { %1513 = vtanh.f32 %v152_v14 }
  0xa6   :  { %v170_v28 = vor.u32 1.1754944e-38, %v169_v23  ;;  %vm168_vm9 = vcmp.eq.f32.partialorder %v167_v25, 8.507059e+37 }
  0xaa   :  { %v1512_v19 = vpop.eup %1511 }
  0xab   :  { %v159_v21 = vmul.f32 %v1512_v19, %v157_v17  ;;  %vm164_vm5 = vweird.f32 %v1512_v19  ;;  %v1514_v30 = vpop.eup %1513 }
  0xac   :  { %vm165_vm8 = vmor %vm163_vm7, %vm164_vm5 }
  0xad   :  { %v160_v22 = vsub.f32 1.0, %v159_v21 }
  0xaf   :  { %v161_v24 = vmul.f32 %v1512_v19, %v160_v22 }
  0xb1   :  { %v162_v27 = vadd.f32 %v1512_v19, %v161_v24 }
  0xb3   :  { %v166_v29 = vsel %vm165_vm8, %v1512_v19, %v162_v27 }
  0xb4   :  { %v171_v31 = vsel %vm168_vm9, %v170_v28, %v166_v29 }
  0xb5   :  { %v173_v32 = vsel %vm1844_vm6, %v1514_v30, %v171_v31 }
  0xb6   :  { %176 = vrot.lane.b32.xlu0 %v173_v32, %s1728_s11  ;;  %v174_v35 = vmul.f32 0.0, %v173_v32 }
 0x128   :  { %v177_v33 = vpop.permute.xlu0 %176 }
 0x129   :  { %v179_v34 = vmul.f32 %v177_v33, %v173_v32 }
 0x12b   :  { %181 = vrot.lane.b32.xlu0 %v179_v34, %s1729_s12 }
 0x19d   :  { %v182_v36 = vpop.permute.xlu0 %181 }
 0x19e   :  { %v1852_v37 = vadd.f32 %v182_v36, %v174_v35 }
 0x1a0   :  { %1515 = vtanh.f32 %v1852_v37 }
 0x1a6   :  { %v1516_v38 = vpop.eup %1515 }
 0x1a7   :  { %187 = vrot.lane.b32.xlu1 %v1516_v38, %s1728_s11 }
 0x219   :  { %v188_v46 = vpop.permute.xlu1 %187 }
 0x21a   :  { %v190_v47 = vmul.f32 %v188_v46, %v173_v32 }
 0x21c   :  { %192 = vrot.lane.b32.xlu1 %v190_v47, %s1729_s12 }
 0x28e   :  { %v193_v51 = vpop.permute.xlu1 %192 }
 0x28f   :  { %v195_v52 = vsel %vm96_vm10, %v193_v51, 0.0  ;;  %1452 = vmatmul.msk.f32.vlgmr.msra.gmra.mxu3 %vm96_vm10, %v193_v51 }
 0x290   :  { %1450 = vmatmul.msk.f32.vlgmr.msrb.gmra.mxu2 %vm196_vm11, %v195_v52  ;;  %583 = vmatpush.msra.mxu3 %v1793_v0 }
 0x291   :  { %831 = vmatpush.msrb.mxu2 %v1859_v39 }
 0x292   :  { %584 = vmatpush.msra.mxu3 %v1813_v4 }
 0x293   :  { %832 = vmatpush.msrb.mxu2 %v1864_v40 }
 0x294   :  { %585 = vmatpush.msra.mxu3 %v1816_v6 }
 0x295   :  { %833 = vmatpush.msrb.mxu2 %v1871_v41 }
 0x296   :  { %586 = vmatpush.msra.mxu3 %v1826_v8 }
 0x297   :  { %834 = vmatpush.msrb.mxu2 %v1878_v42 }
 0x299   :  { %835 = vmatpush.msrb.mxu2 %v1885_v43 }
 0x29b   :  { %836 = vmatpush.msrb.mxu2 %v1892_v44 }
 0x29d   :  { %837 = vmatpush.msrb.mxu2 %v1899_v45 }
 0x29f   :  { %838 = vmatpush.msrb.mxu2 %v1909_v48 }
 0x312   :  { %v277_v55 = vpop.f32.mrf.mxu3 }
 0x313   :  { %v302_v56 = vadd.f32 %v301_v53, %v277_v55  ;;  %v217_v57 = vpop.f32.mrf.mxu2 }
 0x314   :  { %v218_v58 = vadd.f32 %v1953_v54, %v217_v57 }
 0x315   :  { %v304_v59 = vadd.f32 %v1841_v11, %v302_v56 }
 0x316   :  { %v1451_v60 = vmul.f32 -1.442695, %v218_v58 }
 0x317   :  { %v1455_v61 = vmul.f32 -1.442695, %v304_v59 }
 0x318   :  { %1517 = vpow2.f32 %v1451_v60  ;;  %v435_v60 = vrot.slane %v1806_v2, 2 }
 0x319   :  { %1519 = vpow2.f32 %v1455_v61  ;;  %v436_v61 = vrot.slane %v1811_v3, 1 }
 0x31e   :  { %v1518_v62 = vpop.eup %1517 }
 0x31f   :  { %v1520_v63 = vpop.eup %1519  ;;  %v224_v5 = vadd.f32 1.0, %v1518_v62  ;;  %v437_v62 = vsel %vm123_vm1, %v436_v61, %v435_v60 }
 0x320   :  { %v309_v7 = vadd.f32 1.0, %v1520_v63  ;;  %1460 = vmatmul.msk.f32.vlgmr.msrb.gmra.mxu1 %vm125_vm2, %v437_v62 }
 0x321   :  { %1521 = vrcp.f32 %v224_v5  ;;  %v236_v27 = vand.u32 2147483648, %v224_v5  ;;  %vm230_vm4 = vweird.f32 %v224_v5  ;;  %v234_v29 = vand.u32 2147483647, %v224_v5  ;;  %1471 = vmatpush.msk.msrb.mxu1 %vm128_vm0, %v1798_v1 }
 0x322   :  { %1523 = vrcp.f32 %v309_v7  ;;  %v321_v16 = vand.u32 2147483648, %v309_v7  ;;  %v319_v18 = vand.u32 2147483647, %v309_v7  ;;  %vm315_vm13 = vweird.f32 %v309_v7 }
 0x323   :  { %1525 = vtanh.f32 %v304_v59  ;;  %v237_v31 = vor.u32 1.1754944e-38, %v236_v27  ;;  %vm235_vm7 = vcmp.eq.f32.partialorder %v234_v29, 8.507059e+37 }
 0x324   :  { %v322_v21 = vor.u32 1.1754944e-38, %v321_v16  ;;  %vm320_vm15 = vcmp.eq.f32.partialorder %v319_v18, 8.507059e+37  ;;  %1527 = vtanh.f32 %v218_v58 }
 0x327   :  { %v1522_v9 = vpop.eup %1521 }
 0x328   :  { %v1524_v10 = vpop.eup %1523  ;;  %v226_v12 = vmul.f32 %v1522_v9, %v224_v5  ;;  %vm231_vm3 = vweird.f32 %v1522_v9 }
 0x329   :  { %v311_v13 = vmul.f32 %v1524_v10, %v309_v7  ;;  %vm316_vm12 = vweird.f32 %v1524_v10  ;;  %v1526_v24 = vpop.eup %1525  ;;  %vm232_vm5 = vmor %vm230_vm4, %vm231_vm3 }
 0x32a   :  { %v227_v14 = vsub.f32 1.0, %v226_v12  ;;  %vm317_vm14 = vmor %vm315_vm13, %vm316_vm12  ;;  %v1528_v33 = vpop.eup %1527 }
 0x32b   :  { %v312_v15 = vsub.f32 1.0, %v311_v13 }
 0x32c   :  { %v228_v19 = vmul.f32 %v1522_v9, %v227_v14 }
 0x32d   :  { %v313_v17 = vmul.f32 %v1524_v10, %v312_v15 }
 0x32e   :  { %v229_v23 = vadd.f32 %v1522_v9, %v228_v19 }
 0x32f   :  { %v314_v20 = vadd.f32 %v1524_v10, %v313_v17 }
 0x330   :  { %v233_v30 = vsel %vm232_vm5, %v1522_v9, %v229_v23 }
 0x331   :  { %v318_v22 = vsel %vm317_vm14, %v1524_v10, %v314_v20  ;;  %v238_v32 = vsel %vm235_vm7, %v237_v31, %v233_v30 }
 0x332   :  { %v323_v25 = vsel %vm320_vm15, %v322_v21, %v318_v22  ;;  %v240_v34 = vsel %vm1844_vm6, %v1528_v33, %v238_v32 }
 0x333   :  { %v325_v28 = vsel %vm1844_vm6, %v1526_v24, %v323_v25  ;;  %v241_v51 = vmul.f32 0.0, %v240_v34 }
 0x334   :  { %328 = vrot.lane.b32.xlu2 %v325_v28, %s1728_s11  ;;  %v326_v47 = vmul.f32 %v325_v28, %v1852_v37 }
 0x33c   :  { %243 = vrot.lane.b32.xlu2 %v240_v34, %s1728_s11 }
 0x38e   :  { %v329_v35 = vpop.permute.xlu2 %328 }
 0x38f   :  { %v331_v36 = vmul.f32 %v329_v35, %v325_v28 }
 0x391   :  { %333 = vrot.lane.b32.xlu0 %v331_v36, %s1729_s12 }
 0x396   :  { %v244_v38 = vpop.permute.xlu2 %243 }
 0x397   :  { %v246_v46 = vmul.f32 %v244_v38, %v240_v34 }
 0x399   :  { %248 = vrot.lane.b32.xlu1 %v246_v46, %s1729_s12 }
 0x39d   :  { %v457_v9 = vpop.f32.mrf.mxu1 }
 0x403   :  { %v334_v49 = vpop.permute.xlu0 %333 }
 0x404   :  { %v1966_v50 = vadd.f32 %v334_v49, %v326_v47 }
 0x406   :  { %1529 = vtanh.f32 %v1966_v50 }
 0x40b   :  { %v249_v52 = vpop.permute.xlu1 %248 }
 0x40c   :  { %v1530_v53 = vpop.eup %1529  ;;  %v1969_v55 = vadd.f32 %v249_v52, %v241_v51 }
 0x40d   :  { %339 = vrot.lane.b32.xlu2 %v1530_v53, %s1728_s11 }
 0x40e   :  { %1531 = vtanh.f32 %v1969_v55 }
 0x414   :  { %v1532_v56 = vpop.eup %1531 }
 0x415   :  { %254 = vrot.lane.b32.xlu0 %v1532_v56, %s1728_s11 }
 0x467   :  { %v340_v57 = vpop.permute.xlu2 %339 }
 0x468   :  { %v342_v58 = vmul.f32 %v340_v57, %v325_v28 }
 0x46a   :  { %344 = vrot.lane.b32.xlu1 %v342_v58, %s1729_s12 }
 0x487   :  { %v255_v37 = vpop.permute.xlu0 %254 }
 0x488   :  { %v257_v59 = vmul.f32 %v255_v37, %v240_v34 }
 0x48a   :  { %348 = vrot.lane.b32.xlu2 %v257_v59, %s1728_s11 }
 0x4dc   :  { %v345_v63 = vpop.permute.xlu1 %344 }
 0x4dd   :  { %1458 = vmatmul.msk.f32.vlgmr.msrb.gmra.mxu3 %vm96_vm10, %v345_v63 }
 0x4de   :  { %739 = vmatpush.msrb.mxu3 %v1793_v0 }
 0x4e0   :  { %740 = vmatpush.msrb.mxu3 %v1813_v4 }
 0x4e2   :  { %741 = vmatpush.msrb.mxu3 %v1816_v6 }
 0x4e4   :  { %v349_v5 = vpop.permute.xlu2 %348  ;;  %742 = vmatpush.msrb.mxu3 %v1826_v8 }
 0x4e5   :  { %v351_v7 = vsel %vm96_vm10, %v345_v63, %v349_v5 }
 0x4e6   :  { %1456 = vmatmul.msk.f32.vlgmr.msrb.gmra.mxu0 %vm196_vm11, %v351_v7 }
 0x4e7   :  { %987 = vmatpush.msrb.mxu0 %v1859_v39 }
 0x4e9   :  { %988 = vmatpush.msrb.mxu0 %v1864_v40 }
 0x4eb   :  { %989 = vmatpush.msrb.mxu0 %v1871_v41 }
 0x4ed   :  { %990 = vmatpush.msrb.mxu0 %v1878_v42 }
 0x4ef   :  { %991 = vmatpush.msrb.mxu0 %v1885_v43 }
 0x4f1   :  { %992 = vmatpush.msrb.mxu0 %v1892_v44 }
 0x4f3   :  { %993 = vmatpush.msrb.mxu0 %v1899_v45 }
 0x4f5   :  { %994 = vmatpush.msrb.mxu0 %v1909_v48 }
 0x560   :  { %v432_v10 = vpop.f32.mrf.mxu3 }
 0x561   :  { %v458_v12 = vadd.f32 %v457_v9, %v432_v10 }
 0x563   :  { %v460_v13 = vadd.f32 %v1841_v11, %v458_v12  ;;  %v372_v14 = vpop.f32.mrf.mxu0 }
 0x564   :  { %v373_v15 = vadd.f32 %v1953_v54, %v372_v14 }
 0x565   :  { %v1461_v16 = vmul.f32 -1.442695, %v460_v13 }
 0x566   :  { %v1457_v17 = vmul.f32 -1.442695, %v373_v15 }
 0x567   :  { %1533 = vpow2.f32 %v1461_v16 }
 0x568   :  { %1535 = vpow2.f32 %v1457_v17  ;;  %v591_v17 = vrot.slane %v1806_v2, 3 }
 0x56d   :  { %v1534_v18 = vpop.eup %1533 }
 0x56e   :  { %v1536_v19 = vpop.eup %1535  ;;  %v465_v20 = vadd.f32 1.0, %v1534_v18 }
 0x56f   :  { %v379_v21 = vadd.f32 1.0, %v1536_v19 }
 0x570   :  { %1537 = vrcp.f32 %v465_v20  ;;  %v477_v28 = vand.u32 2147483648, %v465_v20  ;;  %v475_v31 = vand.u32 2147483647, %v465_v20  ;;  %vm471_vm12 = vweird.f32 %v465_v20 }
 0x571   :  { %1539 = vrcp.f32 %v379_v21  ;;  %v391_v32 = vand.u32 2147483648, %v379_v21  ;;  %v389_v34 = vand.u32 2147483647, %v379_v21  ;;  %vm385_vm14 = vweird.f32 %v379_v21 }
 0x572   :  { %1541 = vtanh.f32 %v460_v13  ;;  %v478_v36 = vor.u32 1.1754944e-38, %v477_v28  ;;  %vm476_vm15 = vcmp.eq.f32.partialorder %v475_v31, 8.507059e+37 }
 0x573   :  { %1543 = vtanh.f32 %v373_v15  ;;  %v392_v49 = vor.u32 1.1754944e-38, %v391_v32  ;;  %vm390_vm4 = vcmp.eq.f32.partialorder %v389_v34, 8.507059e+37 }
 0x576   :  { %v1538_v22 = vpop.eup %1537 }
 0x577   :  { %v1540_v23 = vpop.eup %1539  ;;  %v467_v24 = vmul.f32 %v1538_v22, %v465_v20  ;;  %vm472_vm8 = vweird.f32 %v1538_v22 }
 0x578   :  { %v381_v25 = vmul.f32 %v1540_v23, %v379_v21  ;;  %vm386_vm9 = vweird.f32 %v1540_v23  ;;  %vm473_vm13 = vmor %vm471_vm12, %vm472_vm8  ;;  %v1542_v46 = vpop.eup %1541 }
 0x579   :  { %v468_v27 = vsub.f32 1.0, %v467_v24  ;;  %vm387_vm3 = vmor %vm385_vm14, %vm386_vm9  ;;  %v1544_v51 = vpop.eup %1543 }
 0x57a   :  { %v382_v29 = vsub.f32 1.0, %v381_v25 }
 0x57b   :  { %v469_v30 = vmul.f32 %v1538_v22, %v468_v27 }
 0x57c   :  { %v383_v33 = vmul.f32 %v1540_v23, %v382_v29 }
 0x57d   :  { %v470_v35 = vadd.f32 %v1538_v22, %v469_v30 }
 0x57e   :  { %v384_v38 = vadd.f32 %v1540_v23, %v383_v33 }
 0x57f   :  { %v474_v47 = vsel %vm473_vm13, %v1538_v22, %v470_v35 }
 0x580   :  { %v479_v52 = vsel %vm476_vm15, %v478_v36, %v474_v47  ;;  %v388_v53 = vsel %vm387_vm3, %v1540_v23, %v384_v38 }
 0x581   :  { %v481_v56 = vsel %vm1844_vm6, %v1542_v46, %v479_v52  ;;  %v393_v57 = vsel %vm390_vm4, %v392_v49, %v388_v53 }
 0x582   :  { %484 = vrot.lane.b32.xlu0 %v481_v56, %s1728_s11  ;;  %v395_v58 = vsel %vm1844_vm6, %v1544_v51, %v393_v57  ;;  %v482_v62 = vmul.f32 %v481_v56, %v1966_v50 }
 0x583   :  { %398 = vrot.lane.b32.xlu1 %v395_v58, %s1728_s11  ;;  %v396_v9 = vmul.f32 %v395_v58, %v1969_v55  ;;  %v592_v55 = vrot.slane %v1811_v3, 2 }
 0x585   :  { %v593_v18 = vsel %vm123_vm1, %v592_v55, %v591_v17 }
 0x586   :  { %1466 = vmatmul.msk.f32.vlgmr.msra.gmra.mxu1 %vm125_vm2, %v593_v18 }
 0x587   :  { %1477 = vmatpush.msk.msra.mxu1 %vm128_vm0, %v1798_v1 }
 0x5f4   :  { %v485_v37 = vpop.permute.xlu0 %484 }
 0x5f5   :  { %v487_v59 = vmul.f32 %v485_v37, %v481_v56  ;;  %v399_v60 = vpop.permute.xlu1 %398 }
 0x5f6   :  { %v401_v61 = vmul.f32 %v399_v60, %v395_v58 }
 0x5f7   :  { %489 = vrot.lane.b32.xlu2 %v487_v59, %s1729_s12 }
 0x5f8   :  { %403 = vrot.lane.b32.xlu0 %v401_v61, %s1729_s12 }
 0x603   :  { %v613_v22 = vpop.f32.mrf.mxu1 }
 0x651   :  { %v490_v63 = vpop.permute.xlu2 %489 }
 0x652   :  { %v2008_v5 = vadd.f32 %v490_v63, %v482_v62 }
 0x654   :  { %1545 = vtanh.f32 %v2008_v5 }
 0x65a   :  { %v1546_v7 = vpop.eup %1545 }
 0x65b   :  { %495 = vrot.lane.b32.xlu1 %v1546_v7, %s1728_s11 }
 0x66a   :  { %v404_v10 = vpop.permute.xlu0 %403 }
 0x66b   :  { %v2013_v12 = vadd.f32 %v404_v10, %v396_v9 }
 0x66d   :  { %1547 = vtanh.f32 %v2013_v12 }
 0x673   :  { %v1548_v13 = vpop.eup %1547 }
 0x674   :  { %409 = vrot.lane.b32.xlu2 %v1548_v13, %s1728_s11 }
 0x6cd   :  { %v496_v14 = vpop.permute.xlu1 %495 }
 0x6ce   :  { %v498_v50 = vmul.f32 %v496_v14, %v481_v56  ;;  %v410_v15 = vpop.permute.xlu2 %409 }
 0x6cf   :  { %v412_v16 = vmul.f32 %v410_v15, %v395_v58 }
 0x6d0   :  { %500 = vrot.lane.b32.xlu0 %v498_v50, %s1729_s12 }
 0x6d1   :  { %504 = vrot.lane.b32.xlu1 %v412_v16, %s1728_s11 }
 0x742   :  { %v501_v19 = vpop.permute.xlu0 %500 }
 0x743   :  { %v505_v20 = vpop.permute.xlu1 %504  ;;  %1464 = vmatmul.msk.f32.vlgmr.msra.gmra.mxu3 %vm96_vm10, %v501_v19 }
 0x744   :  { %v507_v21 = vsel %vm96_vm10, %v501_v19, %v505_v20  ;;  %895 = vmatpush.msra.mxu3 %v1793_v0 }
 0x745   :  { %1462 = vmatmul.msk.f32.vlgmr.msra.gmra.mxu2 %vm196_vm11, %v507_v21 }
 0x746   :  { %896 = vmatpush.msra.mxu3 %v1813_v4  ;;  %1143 = vmatpush.msra.mxu2 %v1859_v39 }
 0x748   :  { %897 = vmatpush.msra.mxu3 %v1816_v6  ;;  %1144 = vmatpush.msra.mxu2 %v1864_v40 }
 0x74a   :  { %898 = vmatpush.msra.mxu3 %v1826_v8  ;;  %1145 = vmatpush.msra.mxu2 %v1871_v41 }
 0x74c   :  { %1146 = vmatpush.msra.mxu2 %v1878_v42 }
 0x74e   :  { %1147 = vmatpush.msra.mxu2 %v1885_v43 }
 0x750   :  { %1148 = vmatpush.msra.mxu2 %v1892_v44 }
 0x752   :  { %1149 = vmatpush.msra.mxu2 %v1899_v45 }
 0x754   :  { %1150 = vmatpush.msra.mxu2 %v1909_v48 }
 0x7c6   :  { %v588_v23 = vpop.f32.mrf.mxu3 }
 0x7c7   :  { %v614_v24 = vadd.f32 %v613_v22, %v588_v23 }
 0x7c8   :  { %v528_v25 = vpop.f32.mrf.mxu2 }
 0x7c9   :  { %v616_v27 = vadd.f32 %v1841_v11, %v614_v24  ;;  %v529_v28 = vadd.f32 %v1953_v54, %v528_v25 }
 0x7cb   :  { %v1467_v29 = vmul.f32 -1.442695, %v616_v27  ;;  %v1463_v30 = vmul.f32 -1.442695, %v529_v28 }
 0x7cd   :  { %1549 = vpow2.f32 %v1467_v29 }
 0x7ce   :  { %1551 = vpow2.f32 %v1463_v30  ;;  %v748_v30 = vrot.slane %v1811_v3, 3 }
 0x7d3   :  { %v1550_v31 = vpop.eup %1549 }
 0x7d4   :  { %v1552_v32 = vpop.eup %1551  ;;  %v621_v33 = vadd.f32 1.0, %v1550_v31 }
 0x7d5   :  { %v535_v34 = vadd.f32 1.0, %v1552_v32 }
 0x7d6   :  { %1553 = vrcp.f32 %v621_v33  ;;  %v633_v49 = vand.u32 2147483648, %v621_v33  ;;  %v631_v53 = vand.u32 2147483647, %v621_v33  ;;  %vm627_vm8 = vweird.f32 %v621_v33 }
 0x7d7   :  { %1555 = vrcp.f32 %v535_v34  ;;  %v547_v56 = vand.u32 2147483648, %v535_v34  ;;  %v545_v58 = vand.u32 2147483647, %v535_v34  ;;  %vm541_vm12 = vweird.f32 %v535_v34 }
 0x7d8   :  { %1557 = vtanh.f32 %v616_v27  ;;  %v634_v59 = vor.u32 1.1754944e-38, %v633_v49  ;;  %vm632_vm13 = vcmp.eq.f32.partialorder %v631_v53, 8.507059e+37 }
 0x7d9   :  { %1559 = vtanh.f32 %v529_v28  ;;  %v548_v63 = vor.u32 1.1754944e-38, %v547_v56  ;;  %vm546_vm15 = vcmp.eq.f32.partialorder %v545_v58, 8.507059e+37 }
 0x7dc   :  { %v1554_v35 = vpop.eup %1553 }
 0x7dd   :  { %v1556_v36 = vpop.eup %1555  ;;  %v623_v38 = vmul.f32 %v1554_v35, %v621_v33  ;;  %vm628_vm5 = vweird.f32 %v1554_v35 }
 0x7de   :  { %v537_v46 = vmul.f32 %v1556_v36, %v535_v34  ;;  %vm542_vm7 = vweird.f32 %v1556_v36  ;;  %vm629_vm9 = vmor %vm627_vm8, %vm628_vm5  ;;  %v1558_v61 = vpop.eup %1557 }
 0x7df   :  { %v624_v47 = vsub.f32 1.0, %v623_v38  ;;  %vm543_vm14 = vmor %vm541_vm12, %vm542_vm7  ;;  %v1560_v7 = vpop.eup %1559 }
 0x7e0   :  { %v538_v51 = vsub.f32 1.0, %v537_v46 }
 0x7e1   :  { %v625_v52 = vmul.f32 %v1554_v35, %v624_v47 }
 0x7e2   :  { %v539_v57 = vmul.f32 %v1556_v36, %v538_v51 }
 0x7e3   :  { %v626_v37 = vadd.f32 %v1554_v35, %v625_v52 }
 0x7e4   :  { %v540_v60 = vadd.f32 %v1556_v36, %v539_v57 }
 0x7e5   :  { %v630_v62 = vsel %vm629_vm9, %v1554_v35, %v626_v37 }
 0x7e6   :  { %v635_v9 = vsel %vm632_vm13, %v634_v59, %v630_v62  ;;  %v544_v10 = vsel %vm543_vm14, %v1556_v36, %v540_v60 }
 0x7e7   :  { %v637_v13 = vsel %vm1844_vm6, %v1558_v61, %v635_v9  ;;  %v549_v14 = vsel %vm546_vm15, %v548_v63, %v544_v10 }
 0x7e8   :  { %640 = vrot.lane.b32.xlu2 %v637_v13, %s1728_s11  ;;  %v551_v50 = vsel %vm1844_vm6, %v1560_v7, %v549_v14  ;;  %v638_v18 = vmul.f32 %v637_v13, %v2008_v5 }
 0x7e9   :  { %554 = vrot.lane.b32.xlu0 %v551_v50, %s1728_s11  ;;  %v552_v20 = vmul.f32 %v551_v50, %v2013_v12  ;;  %v747_v12 = vrot.slane %v1806_v2, 4 }
 0x7eb   :  { %v749_v31 = vsel %vm123_vm1, %v748_v30, %v747_v12  ;;  %v904_v30 = vrot.slane %v1811_v3, 4  ;;  %v1639_v3 = vld [vmem:[#allocation2 + $0x10] sm:$0xff] }
 0x7ec   :  { %1472 = vmatmul.msk.f32.vlgmr.msrb.gmra.mxu1 %vm125_vm2, %v749_v31 }
 0x7ed   :  { %1483 = vmatpush.msk.msrb.mxu1 %vm128_vm0, %v1798_v1 }
 0x842   :  { %v641_v15 = vpop.permute.xlu2 %640 }
 0x843   :  { %v643_v16 = vmul.f32 %v641_v15, %v637_v13 }
 0x845   :  { %645 = vrot.lane.b32.xlu1 %v643_v16, %s1729_s12 }
 0x85b   :  { %v555_v17 = vpop.permute.xlu0 %554 }
 0x85c   :  { %v557_v55 = vmul.f32 %v555_v17, %v551_v50 }
 0x85e   :  { %559 = vrot.lane.b32.xlu2 %v557_v55, %s1729_s12 }
 0x8b7   :  { %v646_v19 = vpop.permute.xlu1 %645 }
 0x8b8   :  { %v2052_v21 = vadd.f32 %v646_v19, %v638_v18  ;;  %v560_v22 = vpop.permute.xlu2 %559 }
 0x8b9   :  { %v2054_v23 = vadd.f32 %v560_v22, %v552_v20 }
 0x8ba   :  { %1561 = vtanh.f32 %v2052_v21 }
 0x8bb   :  { %1563 = vtanh.f32 %v2054_v23 }
 0x8c0   :  { %v1562_v24 = vpop.eup %1561 }
 0x8c1   :  { %v1564_v25 = vpop.eup %1563  ;;  %651 = vrot.lane.b32.xlu0 %v1562_v24, %s1728_s11 }
 0x8c2   :  { %565 = vrot.lane.b32.xlu1 %v1564_v25, %s1728_s11 }
 0x933   :  { %v652_v27 = vpop.permute.xlu0 %651 }
 0x934   :  { %v654_v5 = vmul.f32 %v652_v27, %v637_v13  ;;  %v566_v28 = vpop.permute.xlu1 %565 }
 0x935   :  { %v568_v29 = vmul.f32 %v566_v28, %v551_v50 }
 0x936   :  { %656 = vrot.lane.b32.xlu2 %v654_v5, %s1729_s12 }
 0x937   :  { %660 = vrot.lane.b32.xlu0 %v568_v29, %s1728_s11 }
 0x990   :  { %v657_v32 = vpop.permute.xlu2 %656 }
 0x991   :  { %1470 = vmatmul.msk.f32.vlgmr.msrb.gmra.mxu3 %vm96_vm10, %v657_v32 }
 0x992   :  { %1051 = vmatpush.msrb.mxu3 %v1793_v0  ;;  %v769_v0 = vpop.f32.mrf.mxu1 }
 0x994   :  { %1052 = vmatpush.msrb.mxu3 %v1813_v4 }
 0x996   :  { %1053 = vmatpush.msrb.mxu3 %v1816_v6 }
 0x998   :  { %1054 = vmatpush.msrb.mxu3 %v1826_v8 }
 0x9a9   :  { %v661_v33 = vpop.permute.xlu0 %660 }
 0x9aa   :  { %v663_v34 = vsel %vm96_vm10, %v657_v32, %v661_v33  ;;  %v1637_v32 = vld [vmem:[%s2258_s1] sm:$0xf] }
 0x9ab   :  { %1468 = vmatmul.msk.f32.vlgmr.msra.gmra.mxu0 %vm196_vm11, %v663_v34 }
 0x9ac   :  { %1299 = vmatpush.msra.mxu0 %v1859_v39 }
 0x9ae   :  { %1300 = vmatpush.msra.mxu0 %v1864_v40 }
 0x9b0   :  { %1301 = vmatpush.msra.mxu0 %v1871_v41 }
 0x9b2   :  { %1302 = vmatpush.msra.mxu0 %v1878_v42 }
 0x9b4   :  { %1303 = vmatpush.msra.mxu0 %v1885_v43 }
 0x9b6   :  { %1304 = vmatpush.msra.mxu0 %v1892_v44 }
 0x9b8   :  { %1305 = vmatpush.msra.mxu0 %v1899_v45 }
 0x9ba   :  { %1306 = vmatpush.msra.mxu0 %v1909_v48 }
 0xa14   :  { %v744_v1 = vpop.f32.mrf.mxu3 }
 0xa15   :  { %v770_v4 = vadd.f32 %v769_v0, %v744_v1  ;;  %v1640_v1 = vld [vmem:[#allocation2 + $0x8] sm:$0xff] }
 0xa17   :  { %v772_v6 = vadd.f32 %v1841_v11, %v770_v4 }
 0xa19   :  { %v1473_v39 = vmul.f32 -1.442695, %v772_v6 }
 0xa1b   :  { %1565 = vpow2.f32 %v1473_v39 }
 0xa21   :  { %v1566_v40 = vpop.eup %1565 }
 0xa22   :  { %v777_v35 = vadd.f32 1.0, %v1566_v40 }
 0xa24   :  { %1567 = vrcp.f32 %v777_v35  ;;  %v789_v48 = vand.u32 2147483648, %v777_v35  ;;  %v787_v46 = vand.u32 2147483647, %v777_v35  ;;  %vm783_vm4 = vweird.f32 %v777_v35 }
 0xa26   :  { %v790_v49 = vor.u32 1.1754944e-38, %v789_v48  ;;  %vm788_vm7 = vcmp.eq.f32.partialorder %v787_v46, 8.507059e+37 }
 0xa28   :  { %v684_v41 = vpop.f32.mrf.mxu0 }
 0xa29   :  { %v685_v42 = vadd.f32 %v1953_v54, %v684_v41 }
 0xa2a   :  { %v1568_v43 = vpop.eup %1567 }
 0xa2b   :  { %v1469_v36 = vmul.f32 -1.442695, %v685_v42  ;;  %v779_v44 = vmul.f32 %v1568_v43, %v777_v35  ;;  %vm784_vm3 = vweird.f32 %v1568_v43 }
 0xa2c   :  { %vm785_vm5 = vmor %vm783_vm4, %vm784_vm3 }
 0xa2d   :  { %1569 = vpow2.f32 %v1469_v36  ;;  %v780_v45 = vsub.f32 1.0, %v779_v44 }
 0xa2e   :  { %1571 = vtanh.f32 %v772_v6 }
 0xa2f   :  { %v781_v38 = vmul.f32 %v1568_v43, %v780_v45 }
 0xa31   :  { %v782_v47 = vadd.f32 %v1568_v43, %v781_v38 }
 0xa33   :  { %v1570_v51 = vpop.eup %1569  ;;  %v786_v52 = vsel %vm785_vm5, %v1568_v43, %v782_v47 }
 0xa34   :  { %v1572_v53 = vpop.eup %1571  ;;  %v691_v56 = vadd.f32 1.0, %v1570_v51  ;;  %v791_v57 = vsel %vm788_vm7, %v790_v49, %v786_v52 }
 0xa35   :  { %v793_v58 = vsel %vm1844_vm6, %v1572_v53, %v791_v57 }
 0xa36   :  { %1573 = vrcp.f32 %v691_v56  ;;  %796 = vrot.lane.b32.xlu1 %v793_v58, %s1728_s11  ;;  %v703_v61 = vand.u32 2147483648, %v691_v56  ;;  %v701_v63 = vand.u32 2147483647, %v691_v56  ;;  %vm697_vm9 = vweird.f32 %v691_v56 }
 0xa37   :  { %1575 = vtanh.f32 %v685_v42  ;;  %v794_v22 = vmul.f32 %v793_v58, %v2052_v21  ;;  %v903_v21 = vrot.slane %v1806_v2, 5  ;;  %v1638_v2 = vld [vmem:[#allocation2 + $0x18] sm:$0xff] }
 0xa38   :  { %v704_v9 = vor.u32 1.1754944e-38, %v703_v61  ;;  %vm702_vm13 = vcmp.eq.f32.partialorder %v701_v63, 8.507059e+37 }
 0xa39   :  { %v905_v31 = vsel %vm123_vm1, %v904_v30, %v903_v21 }
 0xa3a   :  { %1478 = vmatmul.msk.f32.vlgmr.msra.gmra.mxu1 %vm125_vm2, %v905_v31  ;;  %v2148_v31 = vld [vmem:[%s2257_s0 + $0x8] sm:$0xff] }
 0xa3b   :  { %1489 = vmatpush.msk.msra.mxu1 %vm128_vm0, %v1637_v32  ;;  %v1060_v32 = vrot.slane %v2148_v31, 5 }
 0xa3c   :  { %v1574_v37 = vpop.eup %1573 }
 0xa3d   :  { %v693_v59 = vmul.f32 %v1574_v37, %v691_v56  ;;  %vm698_vm8 = vweird.f32 %v1574_v37  ;;  %v1576_v13 = vpop.eup %1575 }
 0xa3e   :  { %vm699_vm12 = vmor %vm697_vm9, %vm698_vm8 }
 0xa3f   :  { %v694_v60 = vsub.f32 1.0, %v693_v59 }
 0xa41   :  { %v695_v62 = vmul.f32 %v1574_v37, %v694_v60 }
 0xa43   :  { %v696_v7 = vadd.f32 %v1574_v37, %v695_v62 }
 0xa45   :  { %v700_v10 = vsel %vm699_vm12, %v1574_v37, %v696_v7 }
 0xa46   :  { %v705_v14 = vsel %vm702_vm13, %v704_v9, %v700_v10 }
 0xa47   :  { %v707_v50 = vsel %vm1844_vm6, %v1576_v13, %v705_v14 }
 0xa48   :  { %710 = vrot.lane.b32.xlu2 %v707_v50, %s1728_s11  ;;  %v708_v18 = vmul.f32 %v707_v50, %v2054_v23 }
 0xaa2   :  { %v711_v15 = vpop.permute.xlu2 %710 }
 0xaa3   :  { %v713_v16 = vmul.f32 %v711_v15, %v707_v50 }
 0xaa5   :  { %715 = vrot.lane.b32.xlu1 %v713_v16, %s1729_s12 }
 0xaa8   :  { %v797_v17 = vpop.permute.xlu1 %796 }
 0xaa9   :  { %v799_v55 = vmul.f32 %v797_v17, %v793_v58 }
 0xaab   :  { %801 = vrot.lane.b32.xlu0 %v799_v55, %s1729_s12 }
 0xab7   :  { %v925_v4 = vpop.f32.mrf.mxu1 }
 0xb17   :  { %v716_v19 = vpop.permute.xlu1 %715 }
 0xb18   :  { %v2094_v20 = vadd.f32 %v716_v19, %v708_v18 }
 0xb1a   :  { %1577 = vtanh.f32 %v2094_v20 }
 0xb1d   :  { %v802_v24 = vpop.permute.xlu0 %801 }
 0xb1e   :  { %v2098_v25 = vadd.f32 %v802_v24, %v794_v22 }
 0xb20   :  { %v1578_v27 = vpop.eup %1577  ;;  %1579 = vtanh.f32 %v2098_v25 }
 0xb21   :  { %721 = vrot.lane.b32.xlu0 %v1578_v27, %s1728_s11 }
 0xb26   :  { %v1580_v5 = vpop.eup %1579 }
 0xb27   :  { %807 = vrot.lane.b32.xlu2 %v1580_v5, %s1728_s11 }
 0xb81   :  { %v808_v28 = vpop.permute.xlu2 %807 }
 0xb82   :  { %v810_v23 = vmul.f32 %v808_v28, %v793_v58 }
 0xb84   :  { %812 = vrot.lane.b32.xlu1 %v810_v23, %s1729_s12 }
 0xb93   :  { %v722_v29 = vpop.permute.xlu0 %721 }
 0xb94   :  { %v724_v12 = vmul.f32 %v722_v29, %v707_v50 }
 0xb96   :  { %816 = vrot.lane.b32.xlu2 %v724_v12, %s1728_s11 }
 0xbf0   :  { %v817_v33 = vpop.permute.xlu2 %816 }
 0xbf6   :  { %v813_v34 = vpop.permute.xlu1 %812 }
 0xbf7   :  { %v819_v0 = vsel %vm96_vm10, %v813_v34, %v817_v33  ;;  %1476 = vmatmul.msk.f32.vlgmr.msra.gmra.mxu3 %vm96_vm10, %v813_v34 }
 0xbf8   :  { %1474 = vmatmul.msk.f32.vlgmr.msrb.gmra.mxu2 %vm196_vm11, %v819_v0  ;;  %1207 = vmatpush.msra.mxu3 %v1638_v2 }
 0xbfa   :  { %1208 = vmatpush.msra.mxu3 %v1639_v3 }
 0xbfc   :  { %1209 = vmatpush.msra.mxu3 %v1640_v1 }
 0xbfe   :  { %1210 = vmatpush.msra.mxu3 %v1826_v8 }
 0xc7a   :  { %v900_v6 = vpop.f32.mrf.mxu3 }
 0xc7b   :  { %v926_v39 = vadd.f32 %v925_v4, %v900_v6  ;;  %v840_v40 = vpop.f32.mrf.mxu2 }
 0xc7c   :  { %v841_v35 = vadd.f32 %v1953_v54, %v840_v40 }
 0xc7d   :  { %v928_v41 = vadd.f32 %v1841_v11, %v926_v39 }
 0xc7e   :  { %v1475_v42 = vmul.f32 -1.442695, %v841_v35 }
 0xc7f   :  { %v1479_v43 = vmul.f32 -1.442695, %v928_v41 }
 0xc80   :  { %1581 = vpow2.f32 %v1475_v42 }
 0xc81   :  { %1583 = vpow2.f32 %v1479_v43 }
 0xc86   :  { %v1582_v36 = vpop.eup %1581 }
 0xc87   :  { %v1584_v44 = vpop.eup %1583  ;;  %v847_v45 = vadd.f32 1.0, %v1582_v36 }
 0xc88   :  { %v933_v48 = vadd.f32 1.0, %v1584_v44 }
 0xc89   :  { %1585 = vrcp.f32 %v847_v45  ;;  %v859_v51 = vand.u32 2147483648, %v847_v45  ;;  %v857_v53 = vand.u32 2147483647, %v847_v45  ;;  %vm853_vm15 = vweird.f32 %v847_v45 }
 0xc8a   :  { %1587 = vrcp.f32 %v933_v48  ;;  %v945_v56 = vand.u32 2147483648, %v933_v48  ;;  %v943_v58 = vand.u32 2147483647, %v933_v48  ;;  %vm939_vm4 = vweird.f32 %v933_v48 }
 0xc8b   :  { %1589 = vtanh.f32 %v841_v35  ;;  %v860_v59 = vor.u32 1.1754944e-38, %v859_v51  ;;  %vm858_vm5 = vcmp.eq.f32.partialorder %v857_v53, 8.507059e+37  ;;  %v2160_v35 = vld [vmem:[%s2260_s3] ss:$0 sm:$0xff] }
 0xc8c   :  { %1591 = vtanh.f32 %v928_v41  ;;  %v946_v63 = vor.u32 1.1754944e-38, %v945_v56  ;;  %vm944_vm8 = vcmp.eq.f32.partialorder %v943_v58, 8.507059e+37 }
 0xc8f   :  { %v1586_v38 = vpop.eup %1585 }
 0xc90   :  { %v1588_v8 = vpop.eup %1587  ;;  %v849_v46 = vmul.f32 %v1586_v38, %v847_v45  ;;  %vm854_vm0 = vweird.f32 %v1586_v38 }
 0xc91   :  { %v935_v47 = vmul.f32 %v1588_v8, %v933_v48  ;;  %vm940_vm14 = vweird.f32 %v1588_v8  ;;  %vm855_vm3 = vmor %vm853_vm15, %vm854_vm0  ;;  %v1590_v61 = vpop.eup %1589 }
 0xc92   :  { %v850_v49 = vsub.f32 1.0, %v849_v46  ;;  %vm941_vm7 = vmor %vm939_vm4, %vm940_vm14  ;;  %v1592_v7 = vpop.eup %1591 }
 0xc93   :  { %v936_v52 = vsub.f32 1.0, %v935_v47 }
 0xc94   :  { %v851_v11 = vmul.f32 %v1586_v38, %v850_v49 }
 0xc95   :  { %v937_v57 = vmul.f32 %v1588_v8, %v936_v52 }
 0xc96   :  { %v852_v37 = vadd.f32 %v1586_v38, %v851_v11 }
 0xc97   :  { %v938_v60 = vadd.f32 %v1588_v8, %v937_v57 }
 0xc98   :  { %v856_v62 = vsel %vm855_vm3, %v1586_v38, %v852_v37 }
 0xc99   :  { %v861_v9 = vsel %vm858_vm5, %v860_v59, %v856_v62  ;;  %v942_v10 = vsel %vm941_vm7, %v1588_v8, %v938_v60 }
 0xc9a   :  { %v863_v13 = vsel %vm1844_vm6, %v1590_v61, %v861_v9  ;;  %v947_v14 = vsel %vm944_vm8, %v946_v63, %v942_v10 }
 0xc9b   :  { %866 = vrot.lane.b32.xlu1 %v863_v13, %s1728_s11  ;;  %v949_v50 = vsel %vm1844_vm6, %v1592_v7, %v947_v14  ;;  %v864_v27 = vmul.f32 %v863_v13, %v2094_v20  ;;  %v2142_v20 = vld [vmem:[%s2257_s0] sm:$0xff] }
 0xc9c   :  { %952 = vrot.lane.b32.xlu0 %v949_v50, %s1728_s11  ;;  %v950_v18 = vmul.f32 %v949_v50, %v2098_v25  ;;  %v1059_v30 = vrot.slane %v2142_v20, 6 }
 0xc9e   :  { %v1061_v33 = vsel %vm123_vm1, %v1060_v32, %v1059_v30 }
 0xc9f   :  { %1484 = vmatmul.msk.f32.vlgmr.msrb.gmra.mxu1 %vm125_vm2, %v1061_v33 }
 0xd0d   :  { %v867_v15 = vpop.permute.xlu1 %866 }
 0xd0e   :  { %v869_v16 = vmul.f32 %v867_v15, %v863_v13  ;;  %v953_v17 = vpop.permute.xlu0 %952 }
 0xd0f   :  { %v955_v55 = vmul.f32 %v953_v17, %v949_v50 }
 0xd10   :  { %871 = vrot.lane.b32.xlu0 %v869_v16, %s1729_s12 }
 0xd11   :  { %957 = vrot.lane.b32.xlu2 %v955_v55, %s1729_s12 }
 0xd1c   :  { %v1081_v6 = vpop.f32.mrf.mxu1 }
 0xd6b   :  { %v958_v19 = vpop.permute.xlu2 %957 }
 0xd6c   :  { %v2128_v22 = vadd.f32 %v958_v19, %v950_v18 }
 0xd6e   :  { %1593 = vtanh.f32 %v2128_v22 }
 0xd74   :  { %v1594_v24 = vpop.eup %1593 }
 0xd75   :  { %963 = vrot.lane.b32.xlu1 %v1594_v24, %s1728_s11 }
 0xd82   :  { %v872_v5 = vpop.permute.xlu0 %871 }
 0xd83   :  { %v2133_v28 = vadd.f32 %v872_v5, %v864_v27 }
 0xd85   :  { %1595 = vtanh.f32 %v2133_v28 }
 0xd8b   :  { %v1596_v23 = vpop.eup %1595 }
 0xd8c   :  { %877 = vrot.lane.b32.xlu2 %v1596_v23, %s1728_s11 }
 0xde6   :  { %v878_v29 = vpop.permute.xlu2 %877 }
 0xde7   :  { %v880_v25 = vmul.f32 %v878_v29, %v863_v13  ;;  %v964_v12 = vpop.permute.xlu1 %963 }
 0xde8   :  { %v966_v21 = vmul.f32 %v964_v12, %v949_v50 }
 0xde9   :  { %972 = vrot.lane.b32.xlu1 %v880_v25, %s1728_s11 }
 0xdea   :  { %968 = vrot.lane.b32.xlu0 %v966_v21, %s1729_s12  ;;  %v1216_v21 = vrot.slane %v2148_v31, 6 }
 0xe5b   :  { %v973_v34 = vpop.permute.xlu1 %972 }
 0xe5c   :  { %v969_v0 = vpop.permute.xlu0 %968 }
 0xe5d   :  { %v975_v2 = vsel %vm96_vm10, %v969_v0, %v973_v34  ;;  %1482 = vmatmul.msk.f32.vlgmr.msrb.gmra.mxu3 %vm96_vm10, %v969_v0 }
 0xe5e   :  { %1480 = vmatmul.msk.f32.vlgmr.msrb.gmra.mxu0 %vm196_vm11, %v975_v2 }
 0xedb   :  { %v996_v3 = vpop.f32.mrf.mxu0 }
 0xedc   :  { %v997_v1 = vadd.f32 %v1953_v54, %v996_v3 }
 0xede   :  { %v1481_v4 = vmul.f32 -1.442695, %v997_v1 }
 0xee0   :  { %1597 = vpow2.f32 %v1481_v4  ;;  %v1056_v39 = vpop.f32.mrf.mxu3 }
 0xee1   :  { %v1082_v40 = vadd.f32 %v1081_v6, %v1056_v39  ;;  %v2194_v39 = vld [vmem:[%s2262_s5] ss:$0 sm:$0xff] }
 0xee3   :  { %v1084_v41 = vadd.f32 %v2160_v35, %v1082_v40 }
 0xee5   :  { %v1485_v42 = vmul.f32 -1.442695, %v1084_v41 }
 0xee6   :  { %v1598_v43 = vpop.eup %1597 }
 0xee7   :  { %v1003_v36 = vadd.f32 1.0, %v1598_v43  ;;  %1599 = vpow2.f32 %v1485_v42 }
 0xee9   :  { %1601 = vrcp.f32 %v1003_v36  ;;  %v1015_v8 = vand.u32 2147483648, %v1003_v36  ;;  %v1013_v47 = vand.u32 2147483647, %v1003_v36  ;;  %vm1009_vm12 = vweird.f32 %v1003_v36 }
 0xeeb   :  { %v1016_v52 = vor.u32 1.1754944e-38, %v1015_v8  ;;  %vm1014_vm0 = vcmp.eq.f32.partialorder %v1013_v47, 8.507059e+37 }
 0xeed   :  { %v1600_v44 = vpop.eup %1599 }
 0xeee   :  { %v1089_v45 = vadd.f32 1.0, %v1600_v44 }
 0xeef   :  { %v1602_v54 = vpop.eup %1601 }
 0xef0   :  { %1603 = vrcp.f32 %v1089_v45  ;;  %v1005_v48 = vmul.f32 %v1602_v54, %v1003_v36  ;;  %vm1010_vm9 = vweird.f32 %v1602_v54  ;;  %v1101_v59 = vand.u32 2147483648, %v1089_v45 }
 0xef1   :  { %1605 = vtanh.f32 %v997_v1  ;;  %vm1011_vm13 = vmor %vm1009_vm12, %vm1010_vm9  ;;  %v1099_v61 = vand.u32 2147483647, %v1089_v45  ;;  %vm1095_vm15 = vweird.f32 %v1089_v45 }
 0xef2   :  { %v1006_v38 = vsub.f32 1.0, %v1005_v48  ;;  %1607 = vtanh.f32 %v1084_v41  ;;  %v1102_v63 = vor.u32 1.1754944e-38, %v1101_v59 }
 0xef3   :  { %vm1100_vm4 = vcmp.eq.f32.partialorder %v1099_v61, 8.507059e+37 }
 0xef4   :  { %v1007_v46 = vmul.f32 %v1602_v54, %v1006_v38 }
 0xef6   :  { %v1604_v49 = vpop.eup %1603  ;;  %v1008_v51 = vadd.f32 %v1602_v54, %v1007_v46 }
 0xef7   :  { %v1091_v11 = vmul.f32 %v1604_v49, %v1089_v45  ;;  %v1606_v56 = vpop.eup %1605  ;;  %vm1096_vm14 = vweird.f32 %v1604_v49 }
 0xef8   :  { %v1012_v53 = vsel %vm1011_vm13, %v1602_v54, %v1008_v51  ;;  %vm1097_vm3 = vmor %vm1095_vm15, %vm1096_vm14  ;;  %v1608_v9 = vpop.eup %1607 }
 0xef9   :  { %v1017_v57 = vsel %vm1014_vm0, %v1016_v52, %v1012_v53  ;;  %v1092_v58 = vsub.f32 1.0, %v1091_v11 }
 0xefa   :  { %v1019_v37 = vsel %vm1844_vm6, %v1606_v56, %v1017_v57 }
 0xefb   :  { %1022 = vrot.lane.b32.xlu0 %v1019_v37, %s1728_s11  ;;  %v1093_v60 = vmul.f32 %v1604_v49, %v1092_v58  ;;  %v1020_v17 = vmul.f32 %v1019_v37, %v2133_v28 }
 0xefd   :  { %v1094_v62 = vadd.f32 %v1604_v49, %v1093_v60 }
 0xeff   :  { %v1098_v7 = vsel %vm1097_vm3, %v1604_v49, %v1094_v62 }
 0xf00   :  { %v1103_v10 = vsel %vm1100_vm4, %v1102_v63, %v1098_v7 }
 0xf01   :  { %v1105_v13 = vsel %vm1844_vm6, %v1608_v9, %v1103_v10 }
 0xf02   :  { %1108 = vrot.lane.b32.xlu2 %v1105_v13, %s1728_s11  ;;  %v1106_v19 = vmul.f32 %v1105_v13, %v2128_v22  ;;  %v1215_v22 = vrot.slane %v2142_v20, 7 }
 0xf04   :  { %v1217_v30 = vsel %vm123_vm1, %v1216_v21, %v1215_v22 }
 0xf05   :  { %1490 = vmatmul.msk.f32.vlgmr.msra.gmra.mxu1 %vm125_vm2, %v1217_v30 }
 0xf5c   :  { %v1109_v14 = vpop.permute.xlu2 %1108 }
 0xf5d   :  { %v1111_v50 = vmul.f32 %v1109_v14, %v1105_v13 }
 0xf5f   :  { %1113 = vrot.lane.b32.xlu1 %v1111_v50, %s1729_s12 }
 0xf6d   :  { %v1023_v15 = vpop.permute.xlu0 %1022 }
 0xf6e   :  { %v1025_v16 = vmul.f32 %v1023_v15, %v1019_v37 }
 0xf70   :  { %1027 = vrot.lane.b32.xlu2 %v1025_v16, %s1729_s12 }
 0xf82   :  { %v1237_v0 = vpop.f32.mrf.mxu1 }
 0xfca   :  { %v1028_v55 = vpop.permute.xlu2 %1027 }
 0xfcb   :  { %v2172_v18 = vadd.f32 %v1028_v55, %v1020_v17 }
 0xfcd   :  { %1609 = vtanh.f32 %v2172_v18 }
 0xfd1   :  { %v1114_v24 = vpop.permute.xlu1 %1113 }
 0xfd2   :  { %v2176_v27 = vadd.f32 %v1114_v24, %v1106_v19 }
 0xfd3   :  { %v1610_v5 = vpop.eup %1609 }
 0xfd4   :  { %1611 = vtanh.f32 %v2176_v27  ;;  %1033 = vrot.lane.b32.xlu1 %v1610_v5, %s1728_s11 }
 0xfda   :  { %v1612_v23 = vpop.eup %1611 }
 0xfdb   :  { %1119 = vrot.lane.b32.xlu0 %v1612_v23, %s1728_s11 }
0x1046   :  { %v1034_v29 = vpop.permute.xlu1 %1033 }
0x1047   :  { %v1036_v28 = vmul.f32 %v1034_v29, %v1019_v37 }
0x1049   :  { %1128 = vrot.lane.b32.xlu0 %v1036_v28, %s1728_s11 }
0x104d   :  { %v1120_v25 = vpop.permute.xlu0 %1119 }
0x104e   :  { %v1122_v12 = vmul.f32 %v1120_v25, %v1105_v13 }
0x1050   :  { %1124 = vrot.lane.b32.xlu2 %v1122_v12, %s1729_s12 }
0x10aa   :  { %v1125_v32 = vpop.permute.xlu2 %1124 }
0x10ab   :  { %1488 = vmatmul.msk.f32.vlgmr.msra.gmra.mxu3 %vm96_vm10, %v1125_v32 }
0x10bb   :  { %v1129_v33 = vpop.permute.xlu0 %1128 }
0x10bc   :  { %v1131_v34 = vsel %vm96_vm10, %v1125_v32, %v1129_v33 }
0x10bd   :  { %1486 = vmatmul.msk.f32.vlgmr.msra.gmra.mxu2 %vm196_vm11, %v1131_v34 }
0x112e   :  { %v1212_v2 = vpop.f32.mrf.mxu3 }
0x112f   :  { %v1238_v3 = vadd.f32 %v1237_v0, %v1212_v2 }
0x1131   :  { %v1240_v1 = vadd.f32 %v2160_v35, %v1238_v3 }
0x1133   :  { %v1491_v20 = vmul.f32 -1.442695, %v1240_v1 }
0x1135   :  { %1613 = vpow2.f32 %v1491_v20 }
0x113b   :  { %v1614_v31 = vpop.eup %1613 }
0x113c   :  { %v1245_v4 = vadd.f32 1.0, %v1614_v31 }
0x113e   :  { %1615 = vrcp.f32 %v1245_v4  ;;  %v1257_v35 = vand.u32 2147483648, %v1245_v4  ;;  %v1255_v45 = vand.u32 2147483647, %v1245_v4  ;;  %vm1251_vm2 = vweird.f32 %v1245_v4 }
0x1140   :  { %v1152_v6 = vpop.f32.mrf.mxu2  ;;  %v1258_v8 = vor.u32 1.1754944e-38, %v1257_v35  ;;  %vm1256_vm7 = vcmp.eq.f32.partialorder %v1255_v45, 8.507059e+37  ;;  %v1352_v45 = vld [vmem:[#allocation5 + $0x18] sm:$0xff] }
0x1141   :  { %v1153_v40 = vadd.f32 %v2194_v39, %v1152_v6  ;;  %1374 = vmatpush.msrb.mxu3 %v1352_v45 }
0x1143   :  { %v1487_v41 = vmul.f32 -1.442695, %v1153_v40 }
0x1144   :  { %v1616_v42 = vpop.eup %1615 }
0x1145   :  { %1617 = vpow2.f32 %v1487_v41  ;;  %v1247_v43 = vmul.f32 %v1616_v42, %v1245_v4  ;;  %vm1252_vm1 = vweird.f32 %v1616_v42 }
0x1146   :  { %1619 = vtanh.f32 %v1240_v1  ;;  %vm1253_vm5 = vmor %vm1251_vm2, %vm1252_vm1 }
0x1147   :  { %v1248_v36 = vsub.f32 1.0, %v1247_v43 }
0x1149   :  { %v1249_v44 = vmul.f32 %v1616_v42, %v1248_v36 }
0x114b   :  { %v1618_v54 = vpop.eup %1617  ;;  %v1250_v48 = vadd.f32 %v1616_v42, %v1249_v44 }
0x114c   :  { %v1159_v38 = vadd.f32 1.0, %v1618_v54  ;;  %v1620_v47 = vpop.eup %1619  ;;  %v1351_v54 = vld [vmem:[#allocation5 + $0x10] sm:$0xff] }
0x114d   :  { %v1254_v46 = vsel %vm1253_vm5, %v1616_v42, %v1250_v48  ;;  %v1350_v48 = vld [vmem:[#allocation5 + $0x8] sm:$0xff]  ;;  %1375 = vmatpush.msrb.mxu3 %v1351_v54 }
0x114e   :  { %1621 = vrcp.f32 %v1159_v38  ;;  %v1259_v49 = vsel %vm1256_vm7, %v1258_v8, %v1254_v46  ;;  %v1171_v56 = vand.u32 2147483648, %v1159_v38  ;;  %v1169_v58 = vand.u32 2147483647, %v1159_v38  ;;  %v1390_v46 = vld [vmem:[%s2265_s8 + $0x38] sm:$0xff] }
0x114f   :  { %v1261_v51 = vsel %vm1844_vm6, %v1620_v47, %v1259_v49  ;;  %1623 = vtanh.f32 %v1153_v40  ;;  %vm1165_vm9 = vweird.f32 %v1159_v38  ;;  %1376 = vmatpush.msrb.mxu3 %v1350_v48  ;;  %v1389_v47 = vld [vmem:[%s2265_s8 + $0x30] sm:$0xff]  ;;  %1406 = vmatpush.msrb.mxu1 %v1390_v46  ;;  %v1388_v49 = vld [vmem:[%s2265_s8 + $0x28] sm:$0xff] }
0x1150   :  { %1264 = vrot.lane.b32.xlu2 %v1261_v51, %s1728_s11  ;;  %v1172_v59 = vor.u32 1.1754944e-38, %v1171_v56  ;;  %vm1170_vm13 = vcmp.eq.f32.partialorder %v1169_v58, 8.507059e+37  ;;  %v1262_v14 = vmul.f32 %v1261_v51, %v2176_v27  ;;  %v1384_v56 = vld [vmem:[%s2265_s8 + $0x8] sm:$0xff]  ;;  %v1507_v58 = vld [vmem:[%s2264_s7] ss:$0 sm:$0xff]  ;;  %s1731_s7 = smov 4  }
0x1151   :  { %1377 = vmatpush.msrb.mxu3 %v1349_v26  ;;  %1407 = vmatpush.msrb.mxu1 %v1389_v47 }
0x1153   :  { %1408 = vmatpush.msrb.mxu1 %v1388_v49 }
0x1154   :  { %v1622_v52 = vpop.eup %1621 }
0x1155   :  { %v1161_v11 = vmul.f32 %v1622_v52, %v1159_v38  ;;  %vm1166_vm8 = vweird.f32 %v1622_v52  ;;  %v1624_v61 = vpop.eup %1623 }
0x1156   :  { %vm1167_vm12 = vmor %vm1165_vm9, %vm1166_vm8 }
0x1157   :  { %v1162_v53 = vsub.f32 1.0, %v1161_v11 }
0x1159   :  { %v1163_v57 = vmul.f32 %v1622_v52, %v1162_v53  ;;  %v1385_v53 = vld [vmem:[%s2265_s8 + $0x10] sm:$0xff] }
0x115b   :  { %v1164_v37 = vadd.f32 %v1622_v52, %v1163_v57  ;;  %v1383_v57 = vld [vmem:[%s2265_s8] sm:$0xff] }
0x115d   :  { %v1168_v60 = vsel %vm1167_vm12, %v1622_v52, %v1164_v37  ;;  %v1386_v52 = vld [vmem:[%s2265_s8 + $0x18] sm:$0xff] }
0x115e   :  { %v1173_v62 = vsel %vm1170_vm13, %v1172_v59, %v1168_v60 }
0x115f   :  { %v1175_v63 = vsel %vm1844_vm6, %v1624_v61, %v1173_v62  ;;  %v1508_v61 = vld [vmem:[%s2266_s9] ss:$0 sm:$0xff] }
0x1160   :  { %1178 = vrot.lane.b32.xlu1 %v1175_v63, %s1728_s11  ;;  %v1176_v17 = vmul.f32 %v1175_v63, %v2172_v18 }
0x11aa   :  { %v1265_v7 = vpop.permute.xlu2 %1264 }
0x11ab   :  { %v1267_v9 = vmul.f32 %v1265_v7, %v1261_v51 }
0x11ad   :  { %1269 = vrot.lane.b32.xlu1 %v1267_v9, %s1729_s12 }
0x11d2   :  { %v1179_v10 = vpop.permute.xlu1 %1178 }
0x11d3   :  { %v1181_v13 = vmul.f32 %v1179_v10, %v1175_v63 }
0x11d5   :  { %1183 = vrot.lane.b32.xlu0 %v1181_v13, %s1729_s12 }
0x121f   :  { %v1270_v50 = vpop.permute.xlu1 %1269 }
0x1220   :  { %v1272_v15 = vadd.f32 %v1270_v50, %v1262_v14 }
0x1222   :  { %1625 = vtanh.f32 %v1272_v15 }
0x1228   :  { %v1626_v16 = vpop.eup %1625 }
0x1229   :  { %1275 = vrot.lane.b32.xlu0 %v1626_v16, %s1728_s11 }
0x1247   :  { %v1184_v55 = vpop.permute.xlu0 %1183 }
0x1248   :  { %v1186_v19 = vadd.f32 %v1184_v55, %v1176_v17 }
0x124a   :  { %1627 = vtanh.f32 %v1186_v19 }
0x1250   :  { %v1628_v24 = vpop.eup %1627 }
0x1251   :  { %1189 = vrot.lane.b32.xlu2 %v1628_v24, %s1728_s11 }
0x129b   :  { %v1276_v5 = vpop.permute.xlu0 %1275 }
0x129c   :  { %v1278_v23 = vmul.f32 %v1276_v5, %v1261_v51  ;;  %v1387_v51 = vld [vmem:[%s2265_s8 + $0x20] sm:$0xff] }
0x129d   :  { %1409 = vmatpush.msrb.mxu1 %v1387_v51 }
0x129e   :  { %1280 = vrot.lane.b32.xlu1 %v1278_v23, %s1729_s12 }
0x129f   :  { %1410 = vmatpush.msrb.mxu1 %v1386_v52 }
0x12a1   :  { %1411 = vmatpush.msrb.mxu1 %v1385_v53 }
0x12a3   :  { %1412 = vmatpush.msrb.mxu1 %v1384_v56 }
0x12a5   :  { %1413 = vmatpush.msrb.mxu1 %v1383_v57 }
0x12ab   :  { %v1190_v29 = vpop.permute.xlu2 %1189 }
0x12ac   :  { %v1192_v27 = vmul.f32 %v1190_v29, %v1175_v63 }
0x12ae   :  { %1284 = vrot.lane.b32.xlu2 %v1192_v27, %s1728_s11 }
0x1308   :  { %v1285_v28 = vpop.permute.xlu2 %1284 }
0x1310   :  { %v1281_v25 = vpop.permute.xlu1 %1280 }
0x1311   :  { %v1287_v12 = vsel %vm96_vm10, %v1281_v25, %v1285_v28 }
0x1312   :  { %1492 = vmatmul.msk.f32.vlgmr.msra.gmra.mxu0 %vm196_vm11, %v1287_v12 }
0x138f   :  { %v1308_v18 = vpop.f32.mrf.mxu0 }
0x1390   :  { %v1309_v22 = vadd.f32 %v2194_v39, %v1308_v18 }
0x1392   :  { %v1493_v21 = vmul.f32 -1.442695, %v1309_v22 }
0x1394   :  { %1629 = vpow2.f32 %v1493_v21 }
0x139a   :  { %v1630_v30 = vpop.eup %1629 }
0x139b   :  { %v1315_v32 = vadd.f32 1.0, %v1630_v30 }
0x139d   :  { %1631 = vrcp.f32 %v1315_v32  ;;  %v1327_v2 = vand.u32 2147483648, %v1315_v32  ;;  %v1325_v1 = vand.u32 2147483647, %v1315_v32  ;;  %vm1321_vm14 = vweird.f32 %v1315_v32 }
0x139e   :  { %1633 = vtanh.f32 %v1309_v22 }
0x139f   :  { %v1328_v31 = vor.u32 1.1754944e-38, %v1327_v2  ;;  %vm1326_vm3 = vcmp.eq.f32.partialorder %v1325_v1, 8.507059e+37 }
0x13a3   :  { %v1632_v33 = vpop.eup %1631 }
0x13a4   :  { %v1317_v34 = vmul.f32 %v1632_v33, %v1315_v32  ;;  %vm1322_vm0 = vweird.f32 %v1632_v33  ;;  %v1634_v6 = vpop.eup %1633 }
0x13a5   :  { %vm1323_vm15 = vmor %vm1321_vm14, %vm1322_vm0 }
0x13a6   :  { %v1318_v0 = vsub.f32 1.0, %v1317_v34 }
0x13a8   :  { %v1319_v3 = vmul.f32 %v1632_v33, %v1318_v0 }
0x13aa   :  { %v1320_v20 = vadd.f32 %v1632_v33, %v1319_v3 }
0x13ac   :  { %v1324_v4 = vsel %vm1323_vm15, %v1632_v33, %v1320_v20 }
0x13ad   :  { %v1329_v39 = vsel %vm1326_vm3, %v1328_v31, %v1324_v4 }
0x13ae   :  { %v1331_v40 = vsel %vm1844_vm6, %v1634_v6, %v1329_v39  ;;  %vm1424_vm6 = vcmask 27648  }
0x13af   :  { %1334 = vrot.lane.b32.xlu0 %v1331_v40, %s1728_s11  ;;  %v1332_v43 = vmul.f32 %v1331_v40, %v1186_v19 }
0x1421   :  { %v1335_v41 = vpop.permute.xlu0 %1334 }
0x1422   :  { %v1337_v42 = vmul.f32 %v1335_v41, %v1331_v40 }
0x1424   :  { %1339 = vrot.lane.b32.xlu1 %v1337_v42, %s1729_s12 }
0x1496   :  { %v1340_v36 = vpop.permute.xlu1 %1339 }
0x1497   :  { %v1342_v35 = vadd.f32 %v1340_v36, %v1332_v43 }
0x1499   :  { %1635 = vtanh.f32 %v1342_v35 }
0x149f   :  { %v1636_v44 = vpop.eup %1635 }
0x14a0   :  { %1345 = vrot.lane.b32.xlu2 %v1636_v44, %s1728_s11 }
0x14fa   :  { %v1346_v38 = vpop.permute.xlu2 %1345 }
0x14fb   :  { %v1348_v8 = vmul.f32 %v1346_v38, %v1331_v40 }
0x14fd   :  { %1358 = vrot.lane.b32.xlu0 %v1348_v8, %s1729_s12 }
0x156f   :  { %v1359_v11 = vpop.permute.xlu0 %1358 }
0x1570   :  { %1494 = vmatmul.msk.f32.vlgmr.msrb.gmra.mxu3 %vm96_vm10, %v1359_v11 }
0x15f3   :  { %v1379_v37 = vpop.f32.mrf.mxu3 }
0x15f4   :  { %v1380_v59 = vadd.f32 %v1507_v58, %v1379_v37 }
0x15f6   :  { %v1382_v60 = vmax.f32 %v1380_v59, 0.0 }
0x15f8   :  { %1495 = vmatmul.msk.f32.vlgmr.msrb.gmra.mxu1 %vm196_vm11, %v1382_v60 }
0x1675   :  { %v1415_v62 = vpop.f32.mrf.mxu1 }
0x1676   :  { %v1416_v63 = vadd.f32 %v1508_v61, %v1415_v62 }
0x1678   :  { %v1419_v7 = vrot.slane %v1416_v63, 1  ;;  %v1420_v9 = vperm.slane %v1416_v63, 0 }
0x167a   :  { %v1421_v10 = vperm.slane %v1419_v7, 0  ;;  %1425 = vst.msk [vmem:[#allocation7] sm:$0xf] %vm1424_vm6, %v1420_v9 }
0x167c   :  { %1426 = vst.msk [vmem:[#allocation7 + $0x4] sm:$0xf] %vm1424_vm6, %v1421_v10 }
0x167d   :  { %1439 = dma.vmem_to_hbm [thread:$0]  %s1432_s14, 128, %s1434_s15, [#allocation4], %s1728_s11, %s1728_s11, %s1731_s7  }
0x167e   :  { %1721 = dma.done.wait [#allocation4], 128  }
0x167f   :  { %1722 = vsyncadd [#allocation4], 4294967168 }
0x1680   :  { %1444 = vsyncpa [#allocation3], 1 }
0x1681   :  { %1445 = vsyncpa [#allocation6], 1 }
0x1682   :  { %1446 = vsyncpa [#allocation4], 1 }

</bundles_post_ra>
